<compile_context>
chip_gen: v7x
topology: tpu7x:2x2x1
jax: 0.10.0
libtpu: 0.0.40
codegen_flags: <defaults>
</compile_context>

<pallas_src>
import functools

import jax
import jax.numpy as jnp
from jax.experimental import pallas as pl
from jax.experimental.pallas import tpu as pltpu


# ---------------------------------------------------------------------------
# In-kernel helpers (Pallas-only ops)
# ---------------------------------------------------------------------------

def _k_sigmoid(y):
    # sigmoid via EUP exp + EUP approximate reciprocal (divide off the VALU).
    return pl.reciprocal(1.0 + jnp.exp(-y), approx=True)


def _k_silu(y):
    return y * _k_sigmoid(y)


# ---------------------------------------------------------------------------
# Fused C2f kernel: one batch sample per grid step.
# Activations inside the kernel are (C, P) slabs, P = H*W on the lane axis.
# ---------------------------------------------------------------------------

def _c2f_kernel(H, W, n_blocks,
                x_ref,        # (1, Cin, P)
                mask_ref,     # (9, P)  per-tap validity mask (zero padding)
                w_stem_ref,   # (hidden, Cin)                BN scale folded in
                b_stem_ref,   # (hidden, 1)
                w_blk_ref,    # (n_blocks, hidden, 9*hidden) BN scale folded in
                b_blk_ref,    # (n_blocks, hidden, 1)
                w_fuse_ref,   # (out_ch, hidden*(n_blocks+1))
                b_fuse_ref,   # (out_ch, 1)
                w_se1_ref,    # (cr, out_ch)
                w_se2_ref,    # (out_ch, cr)
                o_ref,        # (1, out_ch, P)
                cat_ref):     # VMEM scratch: (hidden*(n_blocks+1), P)
    P = H * W
    hidden = w_stem_ref.shape[0]

    x = x_ref[0]                                                    # (Cin, P)

    # ---- stem: 1x1 conv + folded-BN bias + SiLU, written into concat slice 0.
    cur = _k_silu(
        jnp.dot(w_stem_ref[...], x, preferred_element_type=jnp.float32)
        + b_stem_ref[...])
    cat_ref[0:hidden, :] = cur

    # ---- bottleneck chain: 3x3 conv (stride 1, pad 1) + bias + SiLU.
    # Single matmul per block (K = 9*hidden).  The im2col operand is built from
    # shifted views of the flattened slab: a 128-wide zero slab on each side
    # gives 128-aligned concatenation, and taps whose source pixel falls
    # outside the image are zeroed with a precomputed mask (this also handles
    # the row wrap-around of the flattened shift).
    zpad = jnp.zeros((hidden, 128), jnp.float32)
    for i in range(n_blocks):
        xpad = jnp.concatenate([zpad, cur, zpad], axis=1)           # (hidden, P+256)
        taps = []
        for t in range(9):
            dy, dx = t // 3 - 1, t % 3 - 1
            d = dy * W + dx                     # flat-index shift of tap t
            if d == 0:
                taps.append(cur)                # center tap: mask is all-ones
            else:
                taps.append(xpad[:, 128 + d:128 + d + P] * mask_ref[t:t + 1, :])
        x9 = jnp.concatenate(taps, axis=0)                          # (9*hidden, P)
        y = jnp.dot(w_blk_ref[i], x9, preferred_element_type=jnp.float32)
        cur = _k_silu(y + b_blk_ref[i])
        cat_ref[(i + 1) * hidden:(i + 2) * hidden, :] = cur

    # ---- fuse: 1x1 conv over the concatenated features + bias + SiLU.
    fused = _k_silu(
        jnp.dot(w_fuse_ref[...], cat_ref[...],
                preferred_element_type=jnp.float32)
        + b_fuse_ref[...])                                          # (out_ch, P)

    # ---- squeeze-excite: global avg pool -> FC -> ReLU -> FC -> sigmoid.
    pooled = jnp.mean(fused, axis=1, keepdims=True)                 # (out_ch, 1)
    h = jnp.maximum(
        jnp.dot(w_se1_ref[...], pooled, preferred_element_type=jnp.float32),
        0.0)
    s = _k_sigmoid(
        jnp.dot(w_se2_ref[...], h, preferred_element_type=jnp.float32))

    o_ref[0] = (fused * s).astype(o_ref.dtype)


# ---------------------------------------------------------------------------
# Wrapper
# ---------------------------------------------------------------------------

def _make_tap_masks(H, W):
    """mask[t, h*W + w] == 1 iff source pixel (h+dy, w+dx) of tap t is inside."""
    hh = jnp.arange(H)[:, None]
    ww = jnp.arange(W)[None, :]
    rows = []
    for t in range(9):
        dy, dx = t // 3 - 1, t % 3 - 1
        valid = ((hh + dy >= 0) & (hh + dy < H) &
                 (ww + dx >= 0) & (ww + dx < W))
        rows.append(valid.reshape(H * W))
    return jnp.stack(rows).astype(jnp.float32)                      # (9, H*W)


@functools.partial(jax.jit, static_argnames=("n_blocks",))
def c2f_block_forward(x_nchw, params, n_blocks=2):
    """C2fBlock forward.  Input and output are NCHW (PyTorch convention)."""
    N, in_ch, H, W = x_nchw.shape
    P = H * W
    assert W + 1 <= 128, "in-kernel halo assumes W + 1 <= 128"
    hidden = params["stem_w"].shape[0]
    out_ch, fuse_in = params["fuse_w"].shape
    cr = params["se_w1"].shape[0]

    # Free reshapes only: no transpose / pad / concat passes in XLA.
    x_flat = x_nchw.reshape(N, in_ch, P).astype(jnp.float32)        # (N, Cin, P)
    mask9 = _make_tap_masks(H, W)                                   # (9, P)
    w_blk = params["blk_w"].reshape(n_blocks, hidden, 9 * hidden)   # tap-major

    kernel = functools.partial(_c2f_kernel, H, W, n_blocks)

    grid_spec = pltpu.PrefetchScalarGridSpec(
        num_scalar_prefetch=0,
        grid=(N,),
        in_specs=[
            pl.BlockSpec((1, in_ch, P), lambda n: (n, 0, 0)),              # x
            pl.BlockSpec((9, P), lambda n: (0, 0)),                        # masks
            pl.BlockSpec((hidden, in_ch), lambda n: (0, 0)),               # stem w
            pl.BlockSpec((hidden, 1), lambda n: (0, 0)),                   # stem b
            pl.BlockSpec((n_blocks, hidden, 9 * hidden), lambda n: (0, 0, 0)),
            pl.BlockSpec((n_blocks, hidden, 1), lambda n: (0, 0, 0)),
            pl.BlockSpec((out_ch, fuse_in), lambda n: (0, 0)),             # fuse w
            pl.BlockSpec((out_ch, 1), lambda n: (0, 0)),                   # fuse b
            pl.BlockSpec((cr, out_ch), lambda n: (0, 0)),                  # se w1
            pl.BlockSpec((out_ch, cr), lambda n: (0, 0)),                  # se w2
        ],
        out_specs=pl.BlockSpec((1, out_ch, P), lambda n: (n, 0, 0)),
        scratch_shapes=[pltpu.VMEM((fuse_in, P), jnp.float32)],            # concat
    )

    out_flat = pl.pallas_call(
        kernel,
        out_shape=jax.ShapeDtypeStruct((N, out_ch, P), jnp.float32),
        grid_spec=grid_spec,
        compiler_params=pltpu.CompilerParams(
            dimension_semantics=("parallel",),   # v7x: batch split over 2 TCs
            vmem_limit_bytes=32 * 1024 * 1024,
        ),
    )(x_flat, mask9, params["stem_w"], params["stem_b"],
      w_blk, params["blk_b"], params["fuse_w"], params["fuse_b"],
      params["se_w1"], params["se_w2"])

    return out_flat.reshape(N, out_ch, H, W)                        # NCHW


# ---------------------------------------------------------------------------
# Parameter construction (synthetic, deterministic), BN folded into weights
# ---------------------------------------------------------------------------

def _bn_scale_bias(key, cout, eps=1e-5):
    k1, k2, k3, k4 = jax.random.split(key, 4)
    gamma = 1.0 + 0.1 * jax.random.normal(k1, (cout,), jnp.float32)
    beta = 0.1 * jax.random.normal(k2, (cout,), jnp.float32)
    mean = 0.1 * jax.random.normal(k3, (cout,), jnp.float32)
    var = jax.random.uniform(k4, (cout,), jnp.float32, minval=0.5, maxval=1.5)
    scale = gamma / jnp.sqrt(var + eps)
    bias = beta - mean * scale
    return scale, bias


def make_c2f_params(key, in_ch, out_ch, n_blocks=2, reduction=8):
    hidden = out_ch // 2
    keys = jax.random.split(key, 2 * n_blocks + 6)
    ki = iter(keys)
    p = {}

    # stem: 1x1 conv (hidden, in_ch) + BN
    w = 0.1 * jax.random.normal(next(ki), (hidden, in_ch), jnp.float32)
    s, b = _bn_scale_bias(next(ki), hidden)
    p["stem_w"], p["stem_b"] = w * s[:, None], b[:, None]

    # bottleneck 3x3 convs, stored tap-major as (Cout, ky, kx, Cin) + BN
    blk_w, blk_b = [], []
    for _ in range(n_blocks):
        w = 0.1 * jax.random.normal(next(ki), (hidden, 3, 3, hidden), jnp.float32)
        s, b = _bn_scale_bias(next(ki), hidden)
        blk_w.append(w * s[:, None, None, None])
        blk_b.append(b[:, None])
    p["blk_w"], p["blk_b"] = jnp.stack(blk_w), jnp.stack(blk_b)

    # fuse: 1x1 conv (out_ch, hidden*(n_blocks+1)) + BN
    fuse_in = hidden * (n_blocks + 1)
    w = 0.1 * jax.random.normal(next(ki), (out_ch, fuse_in), jnp.float32)
    s, b = _bn_scale_bias(next(ki), out_ch)
    p["fuse_w"], p["fuse_b"] = w * s[:, None], b[:, None]

    # squeeze-excite linear layers (no bias)
    cr = max(out_ch // reduction, 1)
    p["se_w1"] = 0.2 * jax.random.normal(next(ki), (cr, out_ch), jnp.float32)
    p["se_w2"] = 0.2 * jax.random.normal(next(ki), (out_ch, cr), jnp.float32)
    return p


# ---------------------------------------------------------------------------
# Pure-JAX reference (NCHW), mirrors the PyTorch module with folded BN
# ---------------------------------------------------------------------------

def _ref_silu(y):
    return y * jax.nn.sigmoid(y)


def c2f_block_reference(x_nchw, params, n_blocks=2):
    x = x_nchw.astype(jnp.float32)
    N, _, H, W = x.shape

    cur = _ref_silu(jnp.einsum("nchw,oc->nohw", x, params["stem_w"])
                    + params["stem_b"].reshape(1, -1, 1, 1))
    outs = [cur]
    for i in range(n_blocks):
        w = params["blk_w"][i]                                      # (Cout,3,3,Cin)
        xp = jnp.pad(cur, ((0, 0), (0, 0), (1, 1), (1, 1)))
        acc = jnp.zeros((N, w.shape[0], H, W), jnp.float32)
        for ky in range(3):
            for kx in range(3):
                acc = acc + jnp.einsum("nchw,oc->nohw",
                                       xp[:, :, ky:ky + H, kx:kx + W],
                                       w[:, ky, kx, :])
        cur = _ref_silu(acc + params["blk_b"][i].reshape(1, -1, 1, 1))
        outs.append(cur)

    cat = jnp.concatenate(outs, axis=1)
    fused = _ref_silu(jnp.einsum("nchw,oc->nohw", cat, params["fuse_w"])
                      + params["fuse_b"].reshape(1, -1, 1, 1))

    pooled = jnp.mean(fused, axis=(2, 3))                           # (N, C)
    h = jax.nn.relu(jnp.einsum("nc,rc->nr", pooled, params["se_w1"]))
    s = jax.nn.sigmoid(jnp.einsum("nr,cr->nc", h, params["se_w2"]))
    return fused * s[:, :, None, None]


# ---------------------------------------------------------------------------
# main
# ---------------------------------------------------------------------------

if __name__ == "__main__":
    in_ch, out_ch, n_blocks = 4, 16, 2
    N, H, W = 2, 16, 16

    key = jax.random.PRNGKey(0)
    k_x, k_p = jax.random.split(key)
    x = jax.random.normal(k_x, (N, in_ch, H, W), jnp.float32)       # NCHW input
    params = make_c2f_params(k_p, in_ch, out_ch, n_blocks=n_blocks)

    out = c2f_block_forward(x, params, n_blocks=n_blocks)
    out = jax.block_until_ready(out)

    assert out.shape == (N, out_ch, H, W), out.shape
    assert bool(jnp.all(jnp.isfinite(out)))

    # Correctness check against the pure-JAX reference (loose tolerance: the
    # kernel's sigmoids use the EUP approximate reciprocal).
    ref = c2f_block_reference(x, params, n_blocks=n_blocks)
    max_err = float(jnp.max(jnp.abs(out - ref)))
    assert bool(jnp.allclose(out, ref, rtol=5e-2, atol=5e-3)), max_err

    print("KERNEL_OK")
</pallas_src>

<mosaic_0001>
module attributes {stable_mosaic.version = 11 : i64} {
  func.func @_c2f_kernel(%arg0: i32, %arg1: memref<1x4x256xf32, #tpu.memory_space<vmem>>, %arg2: memref<9x256xf32, #tpu.memory_space<vmem>>, %arg3: memref<8x4xf32, #tpu.memory_space<vmem>>, %arg4: memref<8x1xf32, #tpu.memory_space<vmem>>, %arg5: memref<2x8x72xf32, #tpu.memory_space<vmem>>, %arg6: memref<2x8x1xf32, #tpu.memory_space<vmem>>, %arg7: memref<16x24xf32, #tpu.memory_space<vmem>>, %arg8: memref<16x1xf32, #tpu.memory_space<vmem>>, %arg9: memref<2x16xf32, #tpu.memory_space<vmem>>, %arg10: memref<16x2xf32, #tpu.memory_space<vmem>>, %arg11: memref<1x16x256xf32, #tpu.memory_space<vmem>>, %arg12: memref<24x256xf32, #tpu.memory_space<vmem>>) attributes {dimension_semantics = [#tpu.dimension_semantics<parallel>], iteration_bounds = array<i64: 2>, scalar_prefetch = 0 : i64, scratch_operands = 1 : i64, tpu.core_type = #tpu.core_type<tc>, window_params = [{transform_indices = @transform_0, window_bounds = array<i64: 1, 4, 256>}, {pipeline_mode = #tpu.pipeline_mode<synchronous>, transform_indices = @transform_1, window_bounds = array<i64: 9, 256>}, {pipeline_mode = #tpu.pipeline_mode<synchronous>, transform_indices = @transform_2, window_bounds = array<i64: 8, 4>}, {pipeline_mode = #tpu.pipeline_mode<synchronous>, transform_indices = @transform_3, window_bounds = array<i64: 8, 1>}, {pipeline_mode = #tpu.pipeline_mode<synchronous>, transform_indices = @transform_4, window_bounds = array<i64: 2, 8, 72>}, {pipeline_mode = #tpu.pipeline_mode<synchronous>, transform_indices = @transform_5, window_bounds = array<i64: 2, 8, 1>}, {pipeline_mode = #tpu.pipeline_mode<synchronous>, transform_indices = @transform_6, window_bounds = array<i64: 16, 24>}, {pipeline_mode = #tpu.pipeline_mode<synchronous>, transform_indices = @transform_7, window_bounds = array<i64: 16, 1>}, {pipeline_mode = #tpu.pipeline_mode<synchronous>, transform_indices = @transform_8, window_bounds = array<i64: 2, 16>}, {pipeline_mode = #tpu.pipeline_mode<synchronous>, transform_indices = @transform_9, window_bounds = array<i64: 16, 2>}, {transform_indices = @transform_10, window_bounds = array<i64: 1, 16, 256>}]} {
    %c0 = arith.constant 0 : index
    %c0_0 = arith.constant 0 : index
    %c0_1 = arith.constant 0 : index
    %0 = vector.load %arg1[%c0, %c0_0, %c0_1] : memref<1x4x256xf32, #tpu.memory_space<vmem>>, vector<1x4x256xf32>
    %1 = vector.shape_cast %0 : vector<1x4x256xf32> to vector<4x256xf32>
    %c0_2 = arith.constant 0 : index
    %c0_3 = arith.constant 0 : index
    %2 = vector.load %arg3[%c0_2, %c0_3] : memref<8x4xf32, #tpu.memory_space<vmem>>, vector<8x4xf32>
    %cst = arith.constant dense<0.000000e+00> : vector<8x256xf32>
    %3 = tpu.matmul %2, %1, %cst {dimension_numbers = #tpu.dot_dimension_numbers<[1], [0], [0], [1], [0, 0, 1, 1], [], []>} : vector<8x4xf32>, vector<4x256xf32>, vector<8x256xf32> -> vector<8x256xf32>
    %c0_4 = arith.constant 0 : index
    %c0_5 = arith.constant 0 : index
    %4 = vector.load %arg4[%c0_4, %c0_5] : memref<8x1xf32, #tpu.memory_space<vmem>>, vector<8x1xf32>
    %5 = vector.broadcast %4 : vector<8x1xf32> to vector<8x256xf32>
    %6 = arith.addf %3, %5 : vector<8x256xf32>
    %cst_6 = arith.constant 0.000000e+00 : f32
    %7 = vector.broadcast %cst_6 : f32 to vector<8x256xf32>
    %8 = arith.subf %7, %6 : vector<8x256xf32>
    %9 = math.exp %8 : vector<8x256xf32>
    %cst_7 = arith.constant 1.000000e+00 : f32
    %10 = vector.broadcast %cst_7 : f32 to vector<8x256xf32>
    %11 = arith.addf %10, %9 : vector<8x256xf32>
    %12 = tpu.reciprocal %11 {approx = true} : vector<8x256xf32> -> vector<8x256xf32>
    %13 = arith.mulf %6, %12 : vector<8x256xf32>
    %c0_8 = arith.constant 0 : index
    %c0_9 = arith.constant 0 : index
    %14 = vector.load %arg12[%c0_8, %c0_9] : memref<24x256xf32, #tpu.memory_space<vmem>>, vector<8x256xf32>
    tpu.vector_store %arg12[%c0_8, %c0_9], %13 {strides = array<i32>} : memref<24x256xf32, #tpu.memory_space<vmem>>, vector<8x256xf32>,
    %cst_10 = arith.constant 0.000000e+00 : f32
    %15 = vector.broadcast %cst_10 : f32 to vector<8x128xf32>
    %16 = tpu.concatenate %15, %13, %15 in 1 : vector<8x128xf32>, vector<8x256xf32>, vector<8x128xf32> -> vector<8x512xf32>
    %17 = vector.extract_strided_slice %16 {offsets = [0, 111], sizes = [8, 256], strides = [1, 1]} : vector<8x512xf32> to vector<8x256xf32>
    %c0_11 = arith.constant 0 : index
    %c0_12 = arith.constant 0 : index
    %18 = vector.load %arg2[%c0_11, %c0_12] : memref<9x256xf32, #tpu.memory_space<vmem>>, vector<1x256xf32>
    %19 = vector.broadcast %18 : vector<1x256xf32> to vector<8x256xf32>
    %20 = arith.mulf %17, %19 : vector<8x256xf32>
    %21 = vector.extract_strided_slice %16 {offsets = [0, 112], sizes = [8, 256], strides = [1, 1]} : vector<8x512xf32> to vector<8x256xf32>
    %c1 = arith.constant 1 : index
    %c0_13 = arith.constant 0 : index
    %22 = vector.load %arg2[%c1, %c0_13] : memref<9x256xf32, #tpu.memory_space<vmem>>, vector<1x256xf32>
    %23 = vector.broadcast %22 : vector<1x256xf32> to vector<8x256xf32>
    %24 = arith.mulf %21, %23 : vector<8x256xf32>
    %25 = vector.extract_strided_slice %16 {offsets = [0, 113], sizes = [8, 256], strides = [1, 1]} : vector<8x512xf32> to vector<8x256xf32>
    %c2 = arith.constant 2 : index
    %c0_14 = arith.constant 0 : index
    %26 = vector.load %arg2[%c2, %c0_14] : memref<9x256xf32, #tpu.memory_space<vmem>>, vector<1x256xf32>
    %27 = vector.broadcast %26 : vector<1x256xf32> to vector<8x256xf32>
    %28 = arith.mulf %25, %27 : vector<8x256xf32>
    %29 = vector.extract_strided_slice %16 {offsets = [0, 127], sizes = [8, 256], strides = [1, 1]} : vector<8x512xf32> to vector<8x256xf32>
    %c3 = arith.constant 3 : index
    %c0_15 = arith.constant 0 : index
    %30 = vector.load %arg2[%c3, %c0_15] : memref<9x256xf32, #tpu.memory_space<vmem>>, vector<1x256xf32>
    %31 = vector.broadcast %30 : vector<1x256xf32> to vector<8x256xf32>
    %32 = arith.mulf %29, %31 : vector<8x256xf32>
    %33 = vector.extract_strided_slice %16 {offsets = [0, 129], sizes = [8, 256], strides = [1, 1]} : vector<8x512xf32> to vector<8x256xf32>
    %c5 = arith.constant 5 : index
    %c0_16 = arith.constant 0 : index
    %34 = vector.load %arg2[%c5, %c0_16] : memref<9x256xf32, #tpu.memory_space<vmem>>, vector<1x256xf32>
    %35 = vector.broadcast %34 : vector<1x256xf32> to vector<8x256xf32>
    %36 = arith.mulf %33, %35 : vector<8x256xf32>
    %37 = vector.extract_strided_slice %16 {offsets = [0, 143], sizes = [8, 256], strides = [1, 1]} : vector<8x512xf32> to vector<8x256xf32>
    %c6 = arith.constant 6 : index
    %c0_17 = arith.constant 0 : index
    %38 = vector.load %arg2[%c6, %c0_17] : memref<9x256xf32, #tpu.memory_space<vmem>>, vector<1x256xf32>
    %39 = vector.broadcast %38 : vector<1x256xf32> to vector<8x256xf32>
    %40 = arith.mulf %37, %39 : vector<8x256xf32>
    %41 = vector.extract_strided_slice %16 {offsets = [0, 144], sizes = [8, 256], strides = [1, 1]} : vector<8x512xf32> to vector<8x256xf32>
    %c7 = arith.constant 7 : index
    %c0_18 = arith.constant 0 : index
    %42 = vector.load %arg2[%c7, %c0_18] : memref<9x256xf32, #tpu.memory_space<vmem>>, vector<1x256xf32>
    %43 = vector.broadcast %42 : vector<1x256xf32> to vector<8x256xf32>
    %44 = arith.mulf %41, %43 : vector<8x256xf32>
    %45 = vector.extract_strided_slice %16 {offsets = [0, 145], sizes = [8, 256], strides = [1, 1]} : vector<8x512xf32> to vector<8x256xf32>
    %c8 = arith.constant 8 : index
    %c0_19 = arith.constant 0 : index
    %46 = vector.load %arg2[%c8, %c0_19] : memref<9x256xf32, #tpu.memory_space<vmem>>, vector<1x256xf32>
    %47 = vector.broadcast %46 : vector<1x256xf32> to vector<8x256xf32>
    %48 = arith.mulf %45, %47 : vector<8x256xf32>
    %49 = tpu.concatenate %20, %24, %28, %32, %13, %36, %40, %44, %48 in 0 : vector<8x256xf32>, vector<8x256xf32>, vector<8x256xf32>, vector<8x256xf32>, vector<8x256xf32>, vector<8x256xf32>, vector<8x256xf32>, vector<8x256xf32>, vector<8x256xf32> -> vector<72x256xf32>
    %c0_20 = arith.constant 0 : index
    %c0_21 = arith.constant 0 : index
    %c0_22 = arith.constant 0 : index
    %50 = vector.load %arg5[%c0_20, %c0_21, %c0_22] : memref<2x8x72xf32, #tpu.memory_space<vmem>>, vector<1x8x72xf32>
    %51 = vector.shape_cast %50 : vector<1x8x72xf32> to vector<8x72xf32>
    %cst_23 = arith.constant dense<0.000000e+00> : vector<8x256xf32>
    %52 = tpu.matmul %51, %49, %cst_23 {dimension_numbers = #tpu.dot_dimension_numbers<[1], [0], [0], [1], [0, 0, 1, 1], [], []>} : vector<8x72xf32>, vector<72x256xf32>, vector<8x256xf32> -> vector<8x256xf32>
    %c0_24 = arith.constant 0 : index
    %c0_25 = arith.constant 0 : index
    %c0_26 = arith.constant 0 : index
    %53 = vector.load %arg6[%c0_24, %c0_25, %c0_26] : memref<2x8x1xf32, #tpu.memory_space<vmem>>, vector<1x8x1xf32>
    %54 = vector.shape_cast %53 : vector<1x8x1xf32> to vector<8x1xf32>
    %55 = vector.broadcast %54 : vector<8x1xf32> to vector<8x256xf32>
    %56 = arith.addf %52, %55 : vector<8x256xf32>
    %cst_27 = arith.constant 0.000000e+00 : f32
    %57 = vector.broadcast %cst_27 : f32 to vector<8x256xf32>
    %58 = arith.subf %57, %56 : vector<8x256xf32>
    %59 = math.exp %58 : vector<8x256xf32>
    %cst_28 = arith.constant 1.000000e+00 : f32
    %60 = vector.broadcast %cst_28 : f32 to vector<8x256xf32>
    %61 = arith.addf %60, %59 : vector<8x256xf32>
    %62 = tpu.reciprocal %61 {approx = true} : vector<8x256xf32> -> vector<8x256xf32>
    %63 = arith.mulf %56, %62 : vector<8x256xf32>
    %c8_29 = arith.constant 8 : index
    %c0_30 = arith.constant 0 : index
    %64 = vector.load %arg12[%c8_29, %c0_30] : memref<24x256xf32, #tpu.memory_space<vmem>>, vector<8x256xf32>
    tpu.vector_store %arg12[%c8_29, %c0_30], %63 {strides = array<i32>} : memref<24x256xf32, #tpu.memory_space<vmem>>, vector<8x256xf32>,
    %65 = tpu.concatenate %15, %63, %15 in 1 : vector<8x128xf32>, vector<8x256xf32>, vector<8x128xf32> -> vector<8x512xf32>
    %66 = vector.extract_strided_slice %65 {offsets = [0, 111], sizes = [8, 256], strides = [1, 1]} : vector<8x512xf32> to vector<8x256xf32>
    %c0_31 = arith.constant 0 : index
    %c0_32 = arith.constant 0 : index
    %67 = vector.load %arg2[%c0_31, %c0_32] : memref<9x256xf32, #tpu.memory_space<vmem>>, vector<1x256xf32>
    %68 = vector.broadcast %67 : vector<1x256xf32> to vector<8x256xf32>
    %69 = arith.mulf %66, %68 : vector<8x256xf32>
    %70 = vector.extract_strided_slice %65 {offsets = [0, 112], sizes = [8, 256], strides = [1, 1]} : vector<8x512xf32> to vector<8x256xf32>
    %c1_33 = arith.constant 1 : index
    %c0_34 = arith.constant 0 : index
    %71 = vector.load %arg2[%c1_33, %c0_34] : memref<9x256xf32, #tpu.memory_space<vmem>>, vector<1x256xf32>
    %72 = vector.broadcast %71 : vector<1x256xf32> to vector<8x256xf32>
    %73 = arith.mulf %70, %72 : vector<8x256xf32>
    %74 = vector.extract_strided_slice %65 {offsets = [0, 113], sizes = [8, 256], strides = [1, 1]} : vector<8x512xf32> to vector<8x256xf32>
    %c2_35 = arith.constant 2 : index
    %c0_36 = arith.constant 0 : index
    %75 = vector.load %arg2[%c2_35, %c0_36] : memref<9x256xf32, #tpu.memory_space<vmem>>, vector<1x256xf32>
    %76 = vector.broadcast %75 : vector<1x256xf32> to vector<8x256xf32>
    %77 = arith.mulf %74, %76 : vector<8x256xf32>
    %78 = vector.extract_strided_slice %65 {offsets = [0, 127], sizes = [8, 256], strides = [1, 1]} : vector<8x512xf32> to vector<8x256xf32>
    %c3_37 = arith.constant 3 : index
    %c0_38 = arith.constant 0 : index
    %79 = vector.load %arg2[%c3_37, %c0_38] : memref<9x256xf32, #tpu.memory_space<vmem>>, vector<1x256xf32>
    %80 = vector.broadcast %79 : vector<1x256xf32> to vector<8x256xf32>
    %81 = arith.mulf %78, %80 : vector<8x256xf32>
    %82 = vector.extract_strided_slice %65 {offsets = [0, 129], sizes = [8, 256], strides = [1, 1]} : vector<8x512xf32> to vector<8x256xf32>
    %c5_39 = arith.constant 5 : index
    %c0_40 = arith.constant 0 : index
    %83 = vector.load %arg2[%c5_39, %c0_40] : memref<9x256xf32, #tpu.memory_space<vmem>>, vector<1x256xf32>
    %84 = vector.broadcast %83 : vector<1x256xf32> to vector<8x256xf32>
    %85 = arith.mulf %82, %84 : vector<8x256xf32>
    %86 = vector.extract_strided_slice %65 {offsets = [0, 143], sizes = [8, 256], strides = [1, 1]} : vector<8x512xf32> to vector<8x256xf32>
    %c6_41 = arith.constant 6 : index
    %c0_42 = arith.constant 0 : index
    %87 = vector.load %arg2[%c6_41, %c0_42] : memref<9x256xf32, #tpu.memory_space<vmem>>, vector<1x256xf32>
    %88 = vector.broadcast %87 : vector<1x256xf32> to vector<8x256xf32>
    %89 = arith.mulf %86, %88 : vector<8x256xf32>
    %90 = vector.extract_strided_slice %65 {offsets = [0, 144], sizes = [8, 256], strides = [1, 1]} : vector<8x512xf32> to vector<8x256xf32>
    %c7_43 = arith.constant 7 : index
    %c0_44 = arith.constant 0 : index
    %91 = vector.load %arg2[%c7_43, %c0_44] : memref<9x256xf32, #tpu.memory_space<vmem>>, vector<1x256xf32>
    %92 = vector.broadcast %91 : vector<1x256xf32> to vector<8x256xf32>
    %93 = arith.mulf %90, %92 : vector<8x256xf32>
    %94 = vector.extract_strided_slice %65 {offsets = [0, 145], sizes = [8, 256], strides = [1, 1]} : vector<8x512xf32> to vector<8x256xf32>
    %c8_45 = arith.constant 8 : index
    %c0_46 = arith.constant 0 : index
    %95 = vector.load %arg2[%c8_45, %c0_46] : memref<9x256xf32, #tpu.memory_space<vmem>>, vector<1x256xf32>
    %96 = vector.broadcast %95 : vector<1x256xf32> to vector<8x256xf32>
    %97 = arith.mulf %94, %96 : vector<8x256xf32>
    %98 = tpu.concatenate %69, %73, %77, %81, %63, %85, %89, %93, %97 in 0 : vector<8x256xf32>, vector<8x256xf32>, vector<8x256xf32>, vector<8x256xf32>, vector<8x256xf32>, vector<8x256xf32>, vector<8x256xf32>, vector<8x256xf32>, vector<8x256xf32> -> vector<72x256xf32>
    %c1_47 = arith.constant 1 : index
    %c0_48 = arith.constant 0 : index
    %c0_49 = arith.constant 0 : index
    %99 = vector.load %arg5[%c1_47, %c0_48, %c0_49] : memref<2x8x72xf32, #tpu.memory_space<vmem>>, vector<1x8x72xf32>
    %100 = vector.shape_cast %99 : vector<1x8x72xf32> to vector<8x72xf32>
    %cst_50 = arith.constant dense<0.000000e+00> : vector<8x256xf32>
    %101 = tpu.matmul %100, %98, %cst_50 {dimension_numbers = #tpu.dot_dimension_numbers<[1], [0], [0], [1], [0, 0, 1, 1], [], []>} : vector<8x72xf32>, vector<72x256xf32>, vector<8x256xf32> -> vector<8x256xf32>
    %c1_51 = arith.constant 1 : index
    %c0_52 = arith.constant 0 : index
    %c0_53 = arith.constant 0 : index
    %102 = vector.load %arg6[%c1_51, %c0_52, %c0_53] : memref<2x8x1xf32, #tpu.memory_space<vmem>>, vector<1x8x1xf32>
    %103 = vector.shape_cast %102 : vector<1x8x1xf32> to vector<8x1xf32>
    %104 = vector.broadcast %103 : vector<8x1xf32> to vector<8x256xf32>
    %105 = arith.addf %101, %104 : vector<8x256xf32>
    %cst_54 = arith.constant 0.000000e+00 : f32
    %106 = vector.broadcast %cst_54 : f32 to vector<8x256xf32>
    %107 = arith.subf %106, %105 : vector<8x256xf32>
    %108 = math.exp %107 : vector<8x256xf32>
    %cst_55 = arith.constant 1.000000e+00 : f32
    %109 = vector.broadcast %cst_55 : f32 to vector<8x256xf32>
    %110 = arith.addf %109, %108 : vector<8x256xf32>
    %111 = tpu.reciprocal %110 {approx = true} : vector<8x256xf32> -> vector<8x256xf32>
    %112 = arith.mulf %105, %111 : vector<8x256xf32>
    %c16 = arith.constant 16 : index
    %c0_56 = arith.constant 0 : index
    %113 = vector.load %arg12[%c16, %c0_56] : memref<24x256xf32, #tpu.memory_space<vmem>>, vector<8x256xf32>
    tpu.vector_store %arg12[%c16, %c0_56], %112 {strides = array<i32>} : memref<24x256xf32, #tpu.memory_space<vmem>>, vector<8x256xf32>,
    %c0_57 = arith.constant 0 : index
    %c0_58 = arith.constant 0 : index
    %114 = vector.load %arg7[%c0_57, %c0_58] : memref<16x24xf32, #tpu.memory_space<vmem>>, vector<16x24xf32>
    %c0_59 = arith.constant 0 : index
    %c0_60 = arith.constant 0 : index
    %115 = vector.load %arg12[%c0_59, %c0_60] : memref<24x256xf32, #tpu.memory_space<vmem>>, vector<24x256xf32>
    %cst_61 = arith.constant dense<0.000000e+00> : vector<16x256xf32>
    %116 = tpu.matmul %114, %115, %cst_61 {dimension_numbers = #tpu.dot_dimension_numbers<[1], [0], [0], [1], [0, 0, 1, 1], [], []>} : vector<16x24xf32>, vector<24x256xf32>, vector<16x256xf32> -> vector<16x256xf32>
    %c0_62 = arith.constant 0 : index
    %c0_63 = arith.constant 0 : index
    %117 = vector.load %arg8[%c0_62, %c0_63] : memref<16x1xf32, #tpu.memory_space<vmem>>, vector<16x1xf32>
    %118 = vector.broadcast %117 : vector<16x1xf32> to vector<16x256xf32>
    %119 = arith.addf %116, %118 : vector<16x256xf32>
    %cst_64 = arith.constant 0.000000e+00 : f32
    %120 = vector.broadcast %cst_64 : f32 to vector<16x256xf32>
    %121 = arith.subf %120, %119 : vector<16x256xf32>
    %122 = math.exp %121 : vector<16x256xf32>
    %cst_65 = arith.constant 1.000000e+00 : f32
    %123 = vector.broadcast %cst_65 : f32 to vector<16x256xf32>
    %124 = arith.addf %123, %122 : vector<16x256xf32>
    %125 = tpu.reciprocal %124 {approx = true} : vector<16x256xf32> -> vector<16x256xf32>
    %126 = arith.mulf %119, %125 : vector<16x256xf32>
    %cst_66 = arith.constant dense<0.000000e+00> : vector<16xf32>
    %127 = vector.multi_reduction <add>, %126, %cst_66 [1] : vector<16x256xf32> to vector<16xf32>
    %128 = vector.shape_cast %127 : vector<16xf32> to vector<16x1xf32>
    %cst_67 = arith.constant 2.560000e+02 : f32
    %129 = vector.broadcast %cst_67 : f32 to vector<16x1xf32>
    %130 = arith.divf %128, %129 : vector<16x1xf32>
    %c0_68 = arith.constant 0 : index
    %c0_69 = arith.constant 0 : index
    %131 = vector.load %arg9[%c0_68, %c0_69] : memref<2x16xf32, #tpu.memory_space<vmem>>, vector<2x16xf32>
    %cst_70 = arith.constant dense<0.000000e+00> : vector<2x1xf32>
    %132 = tpu.matmul %131, %130, %cst_70 {dimension_numbers = #tpu.dot_dimension_numbers<[1], [0], [0], [1], [0, 0, 1, 1], [], []>} : vector<2x16xf32>, vector<16x1xf32>, vector<2x1xf32> -> vector<2x1xf32>
    %cst_71 = arith.constant 0.000000e+00 : f32
    %133 = vector.broadcast %cst_71 : f32 to vector<2x1xf32>
    %134 = arith.maximumf %132, %133 : vector<2x1xf32>
    %c0_72 = arith.constant 0 : index
    %c0_73 = arith.constant 0 : index
    %135 = vector.load %arg10[%c0_72, %c0_73] : memref<16x2xf32, #tpu.memory_space<vmem>>, vector<16x2xf32>
    %cst_74 = arith.constant dense<0.000000e+00> : vector<16x1xf32>
    %136 = tpu.matmul %135, %134, %cst_74 {dimension_numbers = #tpu.dot_dimension_numbers<[1], [0], [0], [1], [0, 0, 1, 1], [], []>} : vector<16x2xf32>, vector<2x1xf32>, vector<16x1xf32> -> vector<16x1xf32>
    %cst_75 = arith.constant 0.000000e+00 : f32
    %137 = vector.broadcast %cst_75 : f32 to vector<16x1xf32>
    %138 = arith.subf %137, %136 : vector<16x1xf32>
    %139 = math.exp %138 : vector<16x1xf32>
    %cst_76 = arith.constant 1.000000e+00 : f32
    %140 = vector.broadcast %cst_76 : f32 to vector<16x1xf32>
    %141 = arith.addf %140, %139 : vector<16x1xf32>
    %142 = tpu.reciprocal %141 {approx = true} : vector<16x1xf32> -> vector<16x1xf32>
    %143 = vector.broadcast %142 : vector<16x1xf32> to vector<16x256xf32>
    %144 = arith.mulf %126, %143 : vector<16x256xf32>
    %c0_77 = arith.constant 0 : index
    %c0_78 = arith.constant 0 : index
    %c0_79 = arith.constant 0 : index
    %145 = vector.load %arg11[%c0_77, %c0_78, %c0_79] : memref<1x16x256xf32, #tpu.memory_space<vmem>>, vector<1x16x256xf32>
    %146 = vector.shape_cast %145 : vector<1x16x256xf32> to vector<16x256xf32>
    %147 = vector.shape_cast %144 : vector<16x256xf32> to vector<1x16x256xf32>
    tpu.vector_store %arg11[%c0_77, %c0_78, %c0_79], %147 {strides = array<i32>} : memref<1x16x256xf32, #tpu.memory_space<vmem>>, vector<1x16x256xf32>,
    return
  }
  func.func @transform_0(%arg0: i32) -> (i32, i32, i32) {
    %c0_i32 = arith.constant 0 : i32
    %c0_i32_0 = arith.constant 0 : i32
    %c0_i32_1 = arith.constant 0 : i32
    return %arg0, %c0_i32, %c0_i32_0 : i32, i32, i32
  }
  func.func @transform_1(%arg0: i32) -> (i32, i32) {
    %c0_i32 = arith.constant 0 : i32
    %c0_i32_0 = arith.constant 0 : i32
    %c0_i32_1 = arith.constant 0 : i32
    return %c0_i32, %c0_i32_0 : i32, i32
  }
  func.func @transform_2(%arg0: i32) -> (i32, i32) {
    %c0_i32 = arith.constant 0 : i32
    %c0_i32_0 = arith.constant 0 : i32
    %c0_i32_1 = arith.constant 0 : i32
    return %c0_i32, %c0_i32_0 : i32, i32
  }
  func.func @transform_3(%arg0: i32) -> (i32, i32) {
    %c0_i32 = arith.constant 0 : i32
    %c0_i32_0 = arith.constant 0 : i32
    %c0_i32_1 = arith.constant 0 : i32
    return %c0_i32, %c0_i32_0 : i32, i32
  }
  func.func @transform_4(%arg0: i32) -> (i32, i32, i32) {
    %c0_i32 = arith.constant 0 : i32
    %c0_i32_0 = arith.constant 0 : i32
    %c0_i32_1 = arith.constant 0 : i32
    %c0_i32_2 = arith.constant 0 : i32
    return %c0_i32, %c0_i32_0, %c0_i32_1 : i32, i32, i32
  }
  func.func @transform_5(%arg0: i32) -> (i32, i32, i32) {
    %c0_i32 = arith.constant 0 : i32
    %c0_i32_0 = arith.constant 0 : i32
    %c0_i32_1 = arith.constant 0 : i32
    %c0_i32_2 = arith.constant 0 : i32
    return %c0_i32, %c0_i32_0, %c0_i32_1 : i32, i32, i32
  }
  func.func @transform_6(%arg0: i32) -> (i32, i32) {
    %c0_i32 = arith.constant 0 : i32
    %c0_i32_0 = arith.constant 0 : i32
    %c0_i32_1 = arith.constant 0 : i32
    return %c0_i32, %c0_i32_0 : i32, i32
  }
  func.func @transform_7(%arg0: i32) -> (i32, i32) {
    %c0_i32 = arith.constant 0 : i32
    %c0_i32_0 = arith.constant 0 : i32
    %c0_i32_1 = arith.constant 0 : i32
    return %c0_i32, %c0_i32_0 : i32, i32
  }
  func.func @transform_8(%arg0: i32) -> (i32, i32) {
    %c0_i32 = arith.constant 0 : i32
    %c0_i32_0 = arith.constant 0 : i32
    %c0_i32_1 = arith.constant 0 : i32
    return %c0_i32, %c0_i32_0 : i32, i32
  }
  func.func @transform_9(%arg0: i32) -> (i32, i32) {
    %c0_i32 = arith.constant 0 : i32
    %c0_i32_0 = arith.constant 0 : i32
    %c0_i32_1 = arith.constant 0 : i32
    return %c0_i32, %c0_i32_0 : i32, i32
  }
  func.func @transform_10(%arg0: i32) -> (i32, i32, i32) {
    %c0_i32 = arith.constant 0 : i32
    %c0_i32_0 = arith.constant 0 : i32
    %c0_i32_1 = arith.constant 0 : i32
    return %arg0, %c0_i32, %c0_i32_0 : i32, i32, i32
  }
}

</mosaic_0001>

<bundles_post_ra>
// kernel: c2f_block_forward.1
= control target key start
LH: loop header
LB: loop body
LE: loop exit
PB: predicated region body
PF: predicated region fallthrough
CT: control target
= control target key end

     0   :  { %s2193_s13 = smov 0   ;;  %s2554_s0 = inlined_call_operand.vmem [shape: f32[2,4,256], index: 0, kind: input, shape index: {}]   ;;  %s2555_s1 = inlined_call_operand.vmem [shape: f32[9,256], index: 1, kind: input, shape index: {}]   ;;  %s2556_s2 = inlined_call_operand.vmem [shape: f32[8,4], index: 2, kind: input, shape index: {}]   ;;  %s2557_s3 = inlined_call_operand.vmem [shape: f32[8,1], index: 3, kind: input, shape index: {}]   ;;  %s2558_s4 = inlined_call_operand.vmem [shape: f32[2,8,72], index: 4, kind: input, shape index: {}]   ;;  %s2559_s5 = inlined_call_operand.vmem [shape: f32[2,8,1], index: 5, kind: input, shape index: {}]   ;;  %s2560_s6 = inlined_call_operand.vmem [shape: f32[16,24], index: 6, kind: input, shape index: {}]   ;;  %s2561_s7 = inlined_call_operand.vmem [shape: f32[16,1], index: 7, kind: input, shape index: {}]   ;;  %s2562_s8 = inlined_call_operand.vmem [shape: f32[2,16], index: 8, kind: input, shape index: {}]   ;;  %s2563_s9 = inlined_call_operand.vmem [shape: f32[16,2], index: 9, kind: input, shape index: {}]   ;;  %s2564_s10 = inlined_call_operand.vmem [shape: f32[2,16,256], index: 10, kind: output, shape index: {}]  }
   0x1 LB: > { %s1750_s14 = sadd.s32 4294967295, %s2119_s13   ;;  %p1754_p0 = scmp.ge.s32.totalorder %s2119_s13, 1  ;;  %s2119_s13 = sphi %s2193_s13, %s20_s13  }
   0x2   : > { %p312_p1 = scmp.lt.s32.totalorder %s2119_s13, 3 }
   0x4   : > { %p313_p2 = pnand %p1754_p0, %p312_p1 }
   0x5   : > { %p350_p3 = scmp.lt.s32.totalorder (!%p313_p2), %s1750_s14, 1  ;;  %v2121_v0 = vmov (!%p313_p2), 0.0   ;;  %v2122_v1 = vmov (!%p313_p2), 0   ;;  %v362_v2 = vld [vmem:[%s2557_s3] sm:$0xff] (!%p313_p2)  ;;  %v466_v3 = vlaneseq (!%p313_p2)  ;;  %vm374_vm0 = vcmask (!%p313_p2), 1043456   ;;  %s2123_s27 = smov (!%p313_p2), 112  }
   0x6   : > { %316 = sbr.rel (%p313_p2) target bundleno = 2299 (0x8fb), region = 60  ;;  %443 = vmatprep.mubr.f32.mxu0 (!%p313_p2), %v2121_v0  ;;  %1872 = vset.pattern.permute.xlu0 (!%p313_p2), %v2122_v1  ;;  %v1762_v5 = vld [vmem:[%s2555_s1 + $0x1] ss:$8 sm:$0x3] (!%p313_p2)  ;;  %vm370_vm1 = vcmask (!%p313_p2), 31744   ;;  %s2124_s30 = smov (!%p313_p2), 113  }
   0x7   : > { %365 = vperm.xlu0 (!%p313_p2), %1872, %v362_v2   ;;  %904 = vmatprep.mubr.f32.mxu1 (!%p313_p2), %v2121_v0  ;;  %v467_v4 = vshrl.u32 (!%p313_p2), %v466_v3, 7  ;;  %v1763_v9 = vld [vmem:[%s2555_s1 + $0x2] ss:$8 sm:$0x3] (!%p313_p2)  ;;  %s2125_s15 = smov (!%p313_p2), 127   ;;  %s2126_s18 = smov (!%p313_p2), 1  }
   0x8   : > { %2063 = vset.pattern.permute.xlu1 (!%p313_p2), %v2122_v1  ;;  %v361_v13 = vld [vmem:[%s2556_s2] sm:$0xff] (!%p313_p2)  ;;  %s2127_s21 = smov (!%p313_p2), 15   ;;  %v1768_v28 = vld [vmem:[%s2555_s1 + $0x10] ss:$8 sm:$0x3] (!%p313_p2)  ;;  %s2128_s24 = smov (!%p313_p2), 16  }
   0x9   : > { %v2215_v6 = vsub.s32 (!%p313_p2), 1, %v467_v4  ;;  %v2217_v7 = vsub.s32 (!%p313_p2), 0, %v467_v4  ;;  %v1764_v16 = vld [vmem:[%s2555_s1 + $0x3] ss:$8 sm:$0x3] (!%p313_p2)  ;;  %s2129_s28 = smov (!%p313_p2), 17  }
   0xa   : > { %v1765_v19 = vld [vmem:[%s2555_s1 + $0x5] ss:$8 sm:$0x3] (!%p313_p2)  ;;  %v1766_v22 = vld [vmem:[%s2555_s1 + $0x6] ss:$8 sm:$0x3] (!%p313_p2) }
   0xb   : > { %v496_v11 = vrot.slane (!%p313_p2), %v1762_v5, %v2215_v6  ;;  %v492_v12 = vrot.slane (!%p313_p2), %v1762_v5, %v2217_v7  ;;  %v515_v14 = vrot.slane (!%p313_p2), %v1763_v9, %v2217_v7  ;;  %v519_v15 = vrot.slane (!%p313_p2), %v1763_v9, %v2215_v6  ;;  %v1767_v25 = vld [vmem:[%s2555_s1 + $0x7] ss:$8 sm:$0x3] (!%p313_p2)  ;;  %v464_v31 = vld [vmem:[%s2555_s1] ss:$8 sm:$0x3] (!%p313_p2) }
   0xc   : > { %v538_v17 = vrot.slane (!%p313_p2), %v1764_v16, %v2217_v7  ;;  %v542_v18 = vrot.slane (!%p313_p2), %v1764_v16, %v2215_v6  ;;  %v561_v20 = vrot.slane (!%p313_p2), %v1765_v19, %v2217_v7  ;;  %v565_v21 = vrot.slane (!%p313_p2), %v1765_v19, %v2215_v6  ;;  %s2130_s29 = smov (!%p313_p2), 111   ;;  %s2131_s11 = smov (!%p313_p2), 126  }
   0xd   : > { %s2572_s14 = smov (!%p350_p3, %s1750_s14), 1  ;;  %499 = vrot.lane.b32.xlu1 %v496_v11, %s2123_s27  ;;  %497 = vrot.lane.b32.xlu0 %v492_v12, %s2123_s27  ;;  %v584_v23 = vrot.slane %v1766_v22, %v2217_v7  ;;  %v588_v24 = vrot.slane %v1766_v22, %v2215_v6  ;;  %v607_v26 = vrot.slane %v1767_v25, %v2217_v7  ;;  %s2132_s12 = smov 110   ;;  %vm547_vm2 = vcmask 1039360  }
   0xe   : > { %s1788_s17 = sshll.u32 %s2572_s14, 3  ;;  %v611_v27 = vrot.slane %v1767_v25, %v2215_v6  ;;  %v630_v29 = vrot.slane %v1768_v28, %v2217_v7  ;;  %v634_v30 = vrot.slane %v1768_v28, %v2215_v6  ;;  %v469_v32 = vrot.slane %v464_v31, %v2217_v7  ;;  %s2133_s16 = smov 96  }
   0xf   : > { %s354_s22 = scalar_lea.vmem %s2554_s0, %s1788_s17  ;;  %v473_v33 = vrot.slane %v464_v31, %v2215_v6  ;;  %vm570_vm3 = vcmask 7168   ;;  %vm501_vm4 = vcmask 916480   ;;  %vm593_vm5 = vcmask 121856   ;;  %s2567_s17 = smov 95  }
  0x10   : > { %v360_v8 = vld [vmem:[%s354_s22] sm:$0xff]  ;;  %vm524_vm6 = vcmask 924672   ;;  %vm616_vm7 = vcmask 130048   ;;  %vm639_vm8 = vcmask 138240   ;;  %vm478_vm9 = vcmask 908288   ;;  %s2565_s19 = smov 94  }
  0x11   : > { %v369_v10 = vcombine.high %v360_v8, %v360_v8  ;;  %520 = vrot.lane.b32.xlu1 %v515_v14, %s2124_s30  ;;  %522 = vrot.lane.b32.xlu0 %v519_v15, %s2124_s30  ;;  %vm667_vm10 = vcmask 1031168   ;;  %vm721_vm11 = vcmask 777216   ;;  %vm697_vm12 = vcmask 900096   ;;  %s2569_s22 = smov 95  }
  0x12   : > { %vm709_vm13 = vcmask 785408   ;;  %vm733_vm14 = vcmask 769024   ;;  %vm836_vm15 = vcmask 588800  }
  0x13   : > { %1759 = vmatprep.subr.msk.mxu0 %vm374_vm0, %v369_v10 }
  0x14   : > { %1760 = vmatpush1.msk.msra.mxu0 %vm374_vm0, %v360_v8  ;;  %vm1387_vm0 = vcmask 195584  }
  0x15   : > { %1761 = vmatmul.mubr.msk.f32.vlgmr.msra.gmra.mrb[0].mxu0 %vm370_vm1, %v361_v13  ;;  %543 = vrot.lane.b32.xlu1 %v538_v17, %s2125_s15  ;;  %vm2137_vm1 = vmmov 0  }
  0x16   : > { %1346 = vmatprep.mubr.f32.mxu0 %v2121_v0  ;;  %545 = vrot.lane.b32.xlu0 %v542_v18, %s2125_s15 }
  0x19   : > { %566 = vrot.lane.b32.xlu1 %v561_v20, %s2126_s18 }
  0x1a   : > { %568 = vrot.lane.b32.xlu0 %v565_v21, %s2126_s18 }
  0x1d   : > { %589 = vrot.lane.b32.xlu1 %v584_v23, %s2127_s21 }
  0x1e   : > { %591 = vrot.lane.b32.xlu0 %v588_v24, %s2127_s21 }
  0x21   : > { %612 = vrot.lane.b32.xlu1 %v607_v26, %s2128_s24 }
  0x22   : > { %614 = vrot.lane.b32.xlu0 %v611_v27, %s2128_s24 }
  0x25   : > { %635 = vrot.lane.b32.xlu1 %v630_v29, %s2129_s28 }
  0x26   : > { %637 = vrot.lane.b32.xlu0 %v634_v30, %s2129_s28 }
  0x29   : > { %474 = vrot.lane.b32.xlu1 %v469_v32, %s2130_s29 }
  0x2a   : > { %476 = vrot.lane.b32.xlu0 %v473_v33, %s2130_s29 }
  0x7f   : > { %v500_v34 = vpop.permute.xlu1 %499 }
  0x83   : > { %v2276_v35 = vpop.permute.xlu1 %520 }
  0x84   : > { %v529_v36 = vmul.f32 0.0, %v2276_v35 }
  0x86   : > { %v366_v37 = vpop.permute.xlu0 %365  ;;  %661 = vrot.lane.b32.xlu1 %v529_v36, %s2131_s11 }
  0x87   : > { %v544_v40 = vpop.permute.xlu1 %543 }
  0x88   : > { %v552_v41 = vmul.f32 0.0, %v544_v40 }
  0x8a   : > { %v498_v38 = vpop.permute.xlu0 %497 }
  0x8b   : > { %v506_v39 = vmul.f32 0.0, %v498_v38  ;;  %v567_v58 = vpop.permute.xlu1 %566  ;;  %v502_v8 = vsel %vm501_vm4, %v498_v38, %v500_v34 }
  0x8d   : > { %650 = vrot.lane.b32.xlu0 %v506_v39, %s2125_s15 }
  0x8e   : > { %v523_v42 = vpop.permute.xlu0 %522 }
  0x8f   : > { %v590_v2 = vpop.permute.xlu1 %589  ;;  %v525_v18 = vsel %vm524_vm6, %v2276_v35, %v523_v42 }
  0x91   : > { %673 = vrot.lane.b32.xlu0 %v552_v41, %s2123_s27 }
  0x92   : > { %v546_v43 = vpop.permute.xlu0 %545 }
  0x93   : > { %v548_v63 = vsel %vm547_vm2, %v544_v40, %v546_v43  ;;  %v613_v16 = vpop.permute.xlu1 %612 }
  0x96   : > { %v569_v44 = vpop.permute.xlu0 %568 }
  0x97   : > { %v577_v45 = vmul.f32 0.0, %v569_v44  ;;  %v571_v5 = vsel %vm570_vm3, %v567_v58, %v569_v44  ;;  %v636_v29 = vpop.permute.xlu1 %635 }
  0x99   : > { %695 = vrot.lane.b32.xlu1 %v577_v45, %s2132_s12 }
  0x9a   : > { %v592_v3 = vpop.permute.xlu0 %591 }
  0x9b   : > { %v594_v14 = vsel %vm593_vm5, %v590_v2, %v592_v3  ;;  %v600_v32 = vmul.f32 0.0, %v592_v3  ;;  %v475_v35 = vpop.permute.xlu1 %474 }
  0x9e   : > { %v615_v17 = vpop.permute.xlu0 %614 }
  0x9f   : > { %v617_v24 = vsel %vm616_vm7, %v613_v16, %v615_v17 }
  0xa2   : > { %v638_v30 = vpop.permute.xlu0 %637 }
  0xa3   : > { %v640_v38 = vsel %vm639_vm8, %v636_v29, %v638_v30  ;;  %v646_v39 = vmul.f32 0.0, %v638_v30 }
  0xa6   : > { %v477_v36 = vpop.permute.xlu0 %476 }
  0xa7   : > { %v479_v40 = vsel %vm478_vm9, %v475_v35, %v477_v36 }
  0xe8   : > { %v445_v46 = vpop.f32.mrb[0].mxu0 }
  0xe9   : > { %v446_v47 = vadd.f32 %v445_v46, %v366_v37  ;;  %v447_v48 = vpop.f32.mrb[1].mxu0 }
  0xea   : > { %v448_v49 = vadd.f32 %v447_v48, %v366_v37 }
  0xeb   : > { %v450_v50 = vsub.f32 0.0, %v446_v47 }
  0xec   : > { %v451_v51 = vsub.f32 0.0, %v448_v49 }
  0xed   : > { %v452_v52 = vmul.f32 1.442695, %v450_v50 }
  0xee   : > { %v454_v53 = vmul.f32 1.442695, %v451_v51 }
  0xef   : > { %2065 = vpow2.f32 %v452_v52 }
  0xf0   : > { %2067 = vpow2.f32 %v454_v53 }
  0xf8   : > { %v662_v45 = vpop.permute.xlu1 %661 }
  0xf9   : > { %v2066_v54 = vpop.eup %2065 }
  0xfa   : > { %v2068_v55 = vpop.eup %2067  ;;  %v456_v56 = vadd.f32 1.0, %v2066_v54 }
  0xfb   : > { %v457_v57 = vadd.f32 1.0, %v2068_v55 }
  0xfc   : > { %2069 = vrcp.f32 %v456_v56 }
  0xfd   : > { %2071 = vrcp.f32 %v457_v57 }
  0xff   : > { %v651_v46 = vpop.permute.xlu0 %650 }
 0x106   : > { %v2070_v59 = vpop.eup %2069 }
 0x107   : > { %v2072_v60 = vpop.eup %2071  ;;  %v2283_v61 = vmul.f32 %v2070_v59, %v446_v47  ;;  %v674_v47 = vpop.permute.xlu0 %673 }
 0x108   : > { %v2285_v62 = vmul.f32 %v2072_v60, %v448_v49  ;;  %v483_v60 = vmul.f32 0.0, %v475_v35 }
 0x109   : > { %v553_v1 = vmul.f32 %v548_v63, %v2283_v61  ;;  %v575_v10 = vmul.f32 %v567_v58, %v2283_v61  ;;  %v507_v13 = vmul.f32 %v502_v8, %v2283_v61  ;;  %v598_v19 = vmul.f32 %v590_v2, %v2283_v61 }
 0x10a   : > { %v554_v4 = vmul.f32 %v546_v43, %v2285_v62  ;;  %v576_v11 = vmul.f32 %v571_v5, %v2285_v62  ;;  %v508_v12 = vmul.f32 %v500_v34, %v2285_v62  ;;  %v1873_v15 = vpack.i.bf16 %v2285_v62, %v2283_v61 }
 0x10b   : > { %v599_v20 = vmul.f32 %v594_v14, %v2285_v62  ;;  %v530_v22 = vmul.f32 %v525_v18, %v2283_v61  ;;  %v531_v23 = vmul.f32 %v523_v42, %v2285_v62  ;;  %v621_v26 = vmul.f32 %v613_v16, %v2283_v61  ;;  %v696_v48 = vpop.permute.xlu1 %695 }
 0x10c   : > { %v1888_v9 = vpack.i.bf16 %v554_v4, %v553_v1  ;;  %1874 = vrot.lane.b32.xlu1 %v1873_v15, %s2130_s29  ;;  %v1893_v21 = vpack.i.bf16 %v576_v11, %v575_v10  ;;  %v1878_v25 = vpack.i.bf16 %v508_v12, %v507_v13  ;;  %v622_v27 = vmul.f32 %v617_v24, %v2285_v62 }
 0x10d   : > { %v1898_v28 = vpack.i.bf16 %v599_v20, %v598_v19  ;;  %v1883_v31 = vpack.i.bf16 %v531_v23, %v530_v22  ;;  %v623_v34 = vmul.f32 0.0, %v615_v17  ;;  %v644_v37 = vmul.f32 %v636_v29, %v2283_v61 }
 0x10e   : > { %1889 = vrot.lane.b32.xlu0 %v1888_v9, %s2123_s27  ;;  %v1903_v33 = vpack.i.bf16 %v622_v27, %v621_v26  ;;  %v645_v41 = vmul.f32 %v640_v38, %v2285_v62  ;;  %v484_v42 = vmul.f32 %v479_v40, %v2283_v61  ;;  %v485_v43 = vmul.f32 %v477_v36, %v2285_v62 }
 0x110   : > { %1879 = vrot.lane.b32.xlu1 %v1878_v25, %s2125_s15  ;;  %v1908_v44 = vpack.i.bf16 %v485_v43, %v484_v42  ;;  %v737_v43 = vld [vmem:[%s2559_s5] sm:$0xff] }
 0x112   : > { %1894 = vrot.lane.b32.xlu0 %v1893_v21, %s2132_s12 }
 0x114   : > { %1884 = vrot.lane.b32.xlu1 %v1883_v31, %s2131_s11 }
 0x116   : > { %1899 = vrot.lane.b32.xlu0 %v1898_v28, %s2133_s16 }
 0x118   : > { %707 = vrot.lane.b32.xlu1 %v600_v32, %s2133_s16 }
 0x11a   : > { %1904 = vrot.lane.b32.xlu0 %v1903_v33, %s2567_s17 }
 0x11c   : > { %719 = vrot.lane.b32.xlu1 %v623_v34, %s2567_s17 }
 0x11e   : > { %727 = vrot.lane.b32.xlu0 %v644_v37, %s2565_s19 }
 0x120   : > { %729 = vrot.lane.b32.xlu1 %v645_v41, %s2565_s19 }
 0x122   : > { %731 = vrot.lane.b32.xlu0 %v646_v39, %s2565_s19 }
 0x124   : > { %1909 = vrot.lane.b32.xlu1 %v1908_v44, %s2129_s28  ;;  %v1770_v44 = vld [vmem:[%s2555_s1 + $0x1] ss:$8 sm:$0x3] }
 0x17e   : > { %v1875_v50 = vpop.permute.xlu1 %1874 }
 0x17f   : > { %v1877_v51 = vunpack.i.h.bf16 %v1875_v50  ;;  %v1876_v52 = vunpack.i.l.bf16 %v1875_v50 }
 0x180   : > { %v1890_v49 = vpop.permute.xlu0 %1889 }
 0x181   : > { %v687_v53 = vsel %vm478_vm9, %v1876_v52, %v1877_v51  ;;  %v1892_v57 = vunpack.i.h.bf16 %v1890_v49  ;;  %v1891_v58 = vunpack.i.l.bf16 %v1890_v49  ;;  %v1772_v49 = vld [vmem:[%s2555_s1 + $0x3] ss:$8 sm:$0x3] }
 0x182   : > { %v1913_v55 = vpack.i.bf16 %v1877_v51, %v687_v53  ;;  %v1880_v56 = vpop.permute.xlu1 %1879  ;;  %v993_v51 = vrot.slane %v1772_v49, %v2217_v7  ;;  %v997_v53 = vrot.slane %v1772_v49, %v2215_v6 }
 0x183   : > { %v1881_v59 = vunpack.i.l.bf16 %v1880_v56  ;;  %v680_v4 = vsel %vm501_vm4, %v1891_v58, %v1892_v57  ;;  %v1882_v5 = vunpack.i.h.bf16 %v1880_v56  ;;  %v679_v11 = vsel %vm501_vm4, %v674_v47, %v1891_v58  ;;  %v1775_v58 = vld [vmem:[%s2555_s1 + $0x7] ss:$8 sm:$0x3] }
 0x184   : > { %v1895_v54 = vpop.permute.xlu0 %1894  ;;  %1914 = vrot.lane.b32.xlu1 %v1913_v55, %s2129_s28  ;;  %v1938_v12 = vpack.i.bf16 %v1892_v57, %v680_v4  ;;  %v951_v47 = vrot.slane %v1770_v44, %v2217_v7  ;;  %v1774_v55 = vld [vmem:[%s2555_s1 + $0x6] ss:$8 sm:$0x3] }
 0x185   : > { %v656_v1 = vsel %vm547_vm2, %v651_v46, %v1881_v59  ;;  %v1896_v13 = vunpack.i.l.bf16 %v1895_v54  ;;  %v657_v16 = vsel %vm547_vm2, %v1881_v59, %v1882_v5  ;;  %v1897_v23 = vunpack.i.h.bf16 %v1895_v54 }
 0x186   : > { %v1885_v2 = vpop.permute.xlu1 %1884  ;;  %v1918_v3 = vpack.i.bf16 %v656_v1, %v483_v60  ;;  %v1928_v20 = vpack.i.bf16 %v1882_v5, %v657_v16  ;;  %v955_v46 = vrot.slane %v1770_v44, %v2215_v6  ;;  %v1035_v57 = vrot.slane %v1774_v55, %v2217_v7 }
 0x187   : > { %v1886_v8 = vunpack.i.l.bf16 %v1885_v2  ;;  %v1887_v17 = vunpack.i.h.bf16 %v1885_v2  ;;  %v1943_v21 = vpack.i.bf16 %v1896_v13, %v1876_v52  ;;  %v698_v31 = vsel %vm697_vm12, %v1896_v13, %v1897_v23  ;;  %v1773_v52 = vld [vmem:[%s2555_s1 + $0x5] ss:$8 sm:$0x3] }
 0x188   : > { %v1900_v63 = vpop.permute.xlu0 %1899  ;;  %1919 = vrot.lane.b32.xlu1 %v1918_v3, %s2129_s28  ;;  %v699_v32 = vsel %vm697_vm12, %v1897_v23, %v696_v48  ;;  %v1014_v54 = vrot.slane %v1773_v52, %v2217_v7  ;;  %v1018_v56 = vrot.slane %v1773_v52, %v2215_v6  ;;  %v1039_v59 = vrot.slane %v1774_v55, %v2215_v6  ;;  %v925_v3 = vld [vmem:[%s2555_s1] ss:$8 sm:$0x3] }
 0x189   : > { %v668_v10 = vsel %vm667_vm10, %v662_v45, %v1886_v8  ;;  %v669_v24 = vsel %vm667_vm10, %v1886_v8, %v1887_v17  ;;  %v1902_v29 = vunpack.i.h.bf16 %v1900_v63  ;;  %v1901_v30 = vunpack.i.l.bf16 %v1900_v63  ;;  %v1771_v45 = vld [vmem:[%s2555_s1 + $0x2] ss:$8 sm:$0x3]  ;;  %v1776_v63 = vld [vmem:[%s2555_s1 + $0x10] ss:$8 sm:$0x3] }
 0x18a   : > { %v708_v14 = vpop.permute.xlu1 %707  ;;  %v1923_v15 = vpack.i.bf16 %v679_v11, %v668_v10  ;;  %v1933_v27 = vpack.i.bf16 %v1887_v17, %v669_v24  ;;  %v1948_v35 = vpack.i.bf16 %v699_v32, %v698_v31  ;;  %v972_v48 = vrot.slane %v1771_v45, %v2217_v7 }
 0x18b   : > { %v710_v36 = vsel %vm709_vm13, %v1901_v30, %v1902_v29  ;;  %v711_v37 = vsel %vm709_vm13, %v1902_v29, %v708_v14  ;;  %v976_v50 = vrot.slane %v1771_v45, %v2215_v6  ;;  %v1056_v60 = vrot.slane %v1775_v58, %v2217_v7 }
 0x18c   : > { %v1905_v9 = vpop.permute.xlu0 %1904  ;;  %1924 = vrot.lane.b32.xlu0 %v1923_v15, %s2129_s28  ;;  %1939 = vrot.lane.b32.xlu1 %v1938_v12, %s2129_s28  ;;  %v1953_v39 = vpack.i.bf16 %v711_v37, %v710_v36  ;;  %v1060_v1 = vrot.slane %v1775_v58, %v2215_v6  ;;  %v1077_v2 = vrot.slane %v1776_v63, %v2217_v7 }
 0x18d   : > { %v1907_v18 = vunpack.i.h.bf16 %v1905_v9  ;;  %v1906_v19 = vunpack.i.l.bf16 %v1905_v9  ;;  %v1081_v4 = vrot.slane %v1776_v63, %v2215_v6  ;;  %v930_v5 = vrot.slane %v925_v3, %v2217_v7 }
 0x18e   : > { %v720_v22 = vpop.permute.xlu1 %719  ;;  %v934_v8 = vrot.slane %v925_v3, %v2215_v6 }
 0x18f   : > { %v722_v25 = vsel %vm721_vm11, %v1906_v19, %v1907_v18  ;;  %v723_v26 = vsel %vm721_vm11, %v1907_v18, %v720_v22  ;;  %v1958_v40 = vpack.i.bf16 %v1906_v19, %v1901_v30 }
 0x190   : > { %1929 = vrot.lane.b32.xlu0 %v1928_v20, %s2129_s28  ;;  %1944 = vrot.lane.b32.xlu1 %v1943_v21, %s2129_s28  ;;  %v1963_v28 = vpack.i.bf16 %v723_v26, %v722_v25  ;;  %v728_v34 = vpop.permute.xlu0 %727 }
 0x192   : > { %v730_v33 = vpop.permute.xlu1 %729 }
 0x193   : > { %v734_v38 = vsel %vm733_vm14, %v728_v34, %v730_v33 }
 0x194   : > { %1934 = vrot.lane.b32.xlu0 %v1933_v27, %s2129_s28  ;;  %1964 = vrot.lane.b32.xlu1 %v1963_v28, %s2129_s28  ;;  %v732_v41 = vpop.permute.xlu0 %731 }
 0x195   : > { %v735_v42 = vsel %vm733_vm14, %v730_v33, %v732_v41 }
 0x196   : > { %v1910_v9 = vpop.permute.xlu1 %1909 }
 0x197   : > { %v1912_v14 = vunpack.i.h.bf16 %v1910_v9  ;;  %v1911_v15 = vunpack.i.l.bf16 %v1910_v9 }
 0x198   : > { %1949 = vrot.lane.b32.xlu0 %v1948_v35, %s2129_s28  ;;  %796 = vrot.lane.b32.xlu1 %v734_v38, %s2129_s28 }
 0x199   : > { %v801_v6 = vsel %vm639_vm8, %v1911_v15, %v1912_v14 }
 0x19c   : > { %1954 = vrot.lane.b32.xlu0 %v1953_v39, %s2129_s28  ;;  %794 = vrot.lane.b32.xlu1 %v728_v34, %s2129_s28 }
 0x1a0   : > { %1959 = vrot.lane.b32.xlu0 %v1958_v40, %s2129_s28  ;;  %956 = vrot.lane.b32.xlu1 %v951_v47, %s2123_s27 }
 0x1a4   : > { %798 = vrot.lane.b32.xlu0 %v735_v42, %s2129_s28  ;;  %977 = vrot.lane.b32.xlu1 %v972_v48, %s2124_s30 }
 0x1a8   : > { %740 = vperm.xlu0 %1872, %v737_v43   ;;  %998 = vrot.lane.b32.xlu1 %v993_v51, %s2125_s15 }
 0x1ac   : > { %958 = vrot.lane.b32.xlu0 %v955_v46, %s2123_s27  ;;  %1019 = vrot.lane.b32.xlu1 %v1014_v54, %s2126_s18 }
 0x1b0   : > { %979 = vrot.lane.b32.xlu0 %v976_v50, %s2124_s30  ;;  %1040 = vrot.lane.b32.xlu1 %v1035_v57, %s2127_s21 }
 0x1b4   : > { %1000 = vrot.lane.b32.xlu0 %v997_v53, %s2125_s15  ;;  %1061 = vrot.lane.b32.xlu1 %v1056_v60, %s2128_s24 }
 0x1b8   : > { %1021 = vrot.lane.b32.xlu0 %v1018_v56, %s2126_s18  ;;  %1082 = vrot.lane.b32.xlu1 %v1077_v2, %s2129_s28 }
 0x1bc   : > { %1042 = vrot.lane.b32.xlu0 %v1039_v59, %s2127_s21  ;;  %935 = vrot.lane.b32.xlu1 %v930_v5, %s2130_s29 }
 0x1c0   : > { %1063 = vrot.lane.b32.xlu0 %v1060_v1, %s2128_s24 }
 0x1c4   : > { %1084 = vrot.lane.b32.xlu0 %v1081_v4, %s2129_s28 }
 0x1c8   : > { %937 = vrot.lane.b32.xlu0 %v934_v8, %s2130_s29 }
 0x1f6   : > { %v1915_v10 = vpop.permute.xlu1 %1914 }
 0x1f7   : > { %v1917_v33 = vunpack.i.h.bf16 %v1915_v10  ;;  %v1916_v34 = vunpack.i.l.bf16 %v1915_v10 }
 0x1f9   : > { %v809_v47 = vsel %vm639_vm8, %v1916_v34, %v1917_v33 }
 0x1fa   : > { %v1920_v11 = vpop.permute.xlu1 %1919 }
 0x1fb   : > { %v1921_v16 = vunpack.i.l.bf16 %v1920_v11  ;;  %v1922_v18 = vunpack.i.h.bf16 %v1920_v11 }
 0x1fd   : > { %v800_v22 = vsel %vm639_vm8, %v1921_v16, %v1911_v15 }
 0x1fe   : > { %v1925_v12 = vpop.permute.xlu0 %1924  ;;  %v1940_v13 = vpop.permute.xlu1 %1939 }
 0x1ff   : > { %v1927_v20 = vunpack.i.h.bf16 %v1925_v12  ;;  %v1942_v23 = vunpack.i.h.bf16 %v1940_v13  ;;  %v1941_v24 = vunpack.i.l.bf16 %v1940_v13  ;;  %v1926_v30 = vunpack.i.l.bf16 %v1925_v12  ;;  %v736_v12 = vld [vmem:[%s2558_s4] sm:$0xff] }
 0x201   : > { %v807_v37 = vsel %vm639_vm8, %v1941_v24, %v1942_v23  ;;  %v806_v39 = vsel %vm639_vm8, %v1927_v20, %v1941_v24 }
 0x202   : > { %v1930_v17 = vpop.permute.xlu0 %1929  ;;  %v1945_v21 = vpop.permute.xlu1 %1944 }
 0x203   : > { %v1932_v19 = vunpack.i.h.bf16 %v1930_v17  ;;  %v1931_v7 = vunpack.i.l.bf16 %v1930_v17  ;;  %v1946_v35 = vunpack.i.l.bf16 %v1945_v21  ;;  %v1947_v44 = vunpack.i.h.bf16 %v1945_v21 }
 0x205   : > { %v803_v25 = vsel %vm639_vm8, %v1931_v7, %v1932_v19  ;;  %v802_v26 = vsel %vm639_vm8, %v1922_v18, %v1931_v7  ;;  %v808_v48 = vsel %vm639_vm8, %v1946_v35, %v1916_v34 }
 0x206   : > { %v1935_v27 = vpop.permute.xlu0 %1934  ;;  %v1808_v28 = vpack.c.bf16 %v803_v25, %v801_v6  ;;  %v1810_v29 = vpack.c.bf16 %v802_v26, %v800_v22  ;;  %v1965_v40 = vpop.permute.xlu1 %1964 }
 0x207   : > { %v1937_v31 = vunpack.i.h.bf16 %v1935_v27  ;;  %v1936_v32 = vunpack.i.l.bf16 %v1935_v27  ;;  %v1967_v49 = vunpack.i.h.bf16 %v1965_v40  ;;  %v1966_v50 = vunpack.i.l.bf16 %v1965_v40 }
 0x208   : > { %1809 = vmatprep.subr.bf16.mxu1 %v1808_v28 }
 0x209   : > { %1811 = vmatpush1.bf16.msra.mxu1 %v1810_v29  ;;  %v805_v36 = vsel %vm639_vm8, %v1936_v32, %v1937_v31  ;;  %v804_v38 = vsel %vm639_vm8, %v1926_v30, %v1936_v32  ;;  %v815_v59 = vsel %vm639_vm8, %v1966_v50, %v1967_v49 }
 0x20a   : > { %v1950_v41 = vpop.permute.xlu0 %1949  ;;  %v1812_v42 = vpack.c.bf16 %v807_v37, %v805_v36  ;;  %v1814_v43 = vpack.c.bf16 %v806_v39, %v804_v38  ;;  %v797_v60 = vpop.permute.xlu1 %796 }
 0x20b   : > { %v1952_v45 = vunpack.i.h.bf16 %v1950_v41  ;;  %v1951_v46 = vunpack.i.l.bf16 %v1950_v41 }
 0x20c   : > { %1813 = vmatprep.subr.bf16.mxu1 %v1812_v42 }
 0x20d   : > { %1815 = vmatpush1.bf16.msra.mxu1 %v1814_v43  ;;  %v811_v51 = vsel %vm639_vm8, %v1951_v46, %v1952_v45  ;;  %v810_v52 = vsel %vm639_vm8, %v1947_v44, %v1951_v46 }
 0x20e   : > { %v1955_v53 = vpop.permute.xlu0 %1954  ;;  %v1816_v54 = vpack.c.bf16 %v811_v51, %v809_v47  ;;  %v1818_v55 = vpack.c.bf16 %v810_v52, %v808_v48  ;;  %v795_v11 = vpop.permute.xlu1 %794 }
 0x20f   : > { %v1957_v56 = vunpack.i.h.bf16 %v1955_v53  ;;  %v1956_v57 = vunpack.i.l.bf16 %v1955_v53  ;;  %v816_v13 = vsel %vm639_vm8, %v795_v11, %v797_v60 }
 0x210   : > { %1817 = vmatprep.subr.bf16.mxu1 %v1816_v54 }
 0x211   : > { %1819 = vmatpush1.bf16.msra.mxu1 %v1818_v55  ;;  %v813_v58 = vsel %vm639_vm8, %v1956_v57, %v1957_v56 }
 0x212   : > { %v1960_v63 = vpop.permute.xlu0 %1959  ;;  %v1820_v1 = vpack.c.bf16 %v815_v59, %v813_v58  ;;  %v957_v17 = vpop.permute.xlu1 %956 }
 0x213   : > { %v1962_v2 = vunpack.i.h.bf16 %v1960_v63  ;;  %v1961_v3 = vunpack.i.l.bf16 %v1960_v63  ;;  %v964_v18 = vmul.f32 0.0, %v957_v17 }
 0x214   : > { %1821 = vmatprep.subr.bf16.mxu1 %v1820_v1 }
 0x215   : > { %v812_v4 = vsel %vm639_vm8, %v1961_v3, %v1956_v57  ;;  %v814_v5 = vsel %vm639_vm8, %v1962_v2, %v1966_v50  ;;  %1096 = vrot.lane.b32.xlu0 %v964_v18, %s2125_s15 }
 0x216   : > { %v799_v8 = vpop.permute.xlu0 %798  ;;  %v1822_v9 = vpack.c.bf16 %v814_v5, %v812_v4  ;;  %v978_v7 = vpop.permute.xlu1 %977 }
 0x217   : > { %v817_v10 = vsel %vm639_vm8, %v797_v60, %v799_v8  ;;  %v985_v20 = vmul.f32 0.0, %v978_v7 }
 0x218   : > { %1823 = vmatpush1.bf16.msra.mxu1 %v1822_v9 }
 0x219   : > { %856 = vmatprep.subr.mxu1 %v817_v10  ;;  %1107 = vrot.lane.b32.xlu1 %v985_v20, %s2131_s11 }
 0x21a   : > { %v999_v22 = vpop.permute.xlu1 %998 }
 0x21b   : > { %v1006_v23 = vmul.f32 0.0, %v999_v22 }
 0x21c   : > { %857 = vmatpush1.msra.mxu1 %v816_v13 }
 0x21d   : > { %1769 = vmatmul.mubr.msk.f32.vlgmr.msra.gmra.mrb[0].mxu1 %vm836_vm15, %v736_v12  ;;  %1118 = vrot.lane.b32.xlu0 %v1006_v23, %s2123_s27 }
 0x21e   : > { %1458 = vmatprep.mubr.f32.mxu1 %v2121_v0  ;;  %v1020_v31 = vpop.permute.xlu1 %1019 }
 0x222   : > { %v1041_v34 = vpop.permute.xlu1 %1040 }
 0x226   : > { %v1062_v37 = vpop.permute.xlu1 %1061 }
 0x227   : > { %v741_v14 = vpop.permute.xlu0 %740 }
 0x22a   : > { %v1083_v42 = vpop.permute.xlu1 %1082 }
 0x22b   : > { %v959_v15 = vpop.permute.xlu0 %958 }
 0x22c   : > { %v960_v46 = vsel %vm501_vm4, %v957_v17, %v959_v15 }
 0x22e   : > { %v2442_v44 = vpop.permute.xlu1 %935 }
 0x22f   : > { %v980_v16 = vpop.permute.xlu0 %979 }
 0x230   : > { %v981_v49 = vsel %vm524_vm6, %v978_v7, %v980_v16 }
 0x233   : > { %v1001_v19 = vpop.permute.xlu0 %1000 }
 0x234   : > { %v1002_v50 = vsel %vm547_vm2, %v999_v22, %v1001_v19 }
 0x237   : > { %v1022_v21 = vpop.permute.xlu0 %1021 }
 0x238   : > { %v1029_v6 = vmul.f32 0.0, %v1022_v21  ;;  %v1023_v51 = vsel %vm570_vm3, %v1020_v31, %v1022_v21  ;;  %vm1588_vm3 = vcmask 1041408  }
 0x23a   : > { %1140 = vrot.lane.b32.xlu1 %v1029_v6, %s2132_s12 }
 0x23b   : > { %v1043_v33 = vpop.permute.xlu0 %1042 }
 0x23c   : > { %v1044_v53 = vsel %vm593_vm5, %v1041_v34, %v1043_v33 }
 0x23f   : > { %v1064_v36 = vpop.permute.xlu0 %1063 }
 0x240   : > { %v1065_v54 = vsel %vm616_vm7, %v1062_v37, %v1064_v36 }
 0x243   : > { %v1085_v41 = vpop.permute.xlu0 %1084 }
 0x244   : > { %v1092_v6 = vmul.f32 0.0, %v1085_v41 }
 0x247   : > { %v938_v43 = vpop.permute.xlu0 %937 }
 0x248   : > { %v939_v55 = vsel %vm478_vm9, %v2442_v44, %v938_v43 }
 0x28b   : > { %v1108_v23 = vpop.permute.xlu1 %1107 }
 0x2f0   : > { %v906_v24 = vpop.f32.mrb[0].mxu1 }
 0x2f1   : > { %v907_v25 = vadd.f32 %v906_v24, %v741_v14  ;;  %v908_v26 = vpop.f32.mrb[1].mxu1  ;;  %v1097_v24 = vpop.permute.xlu0 %1096 }
 0x2f2   : > { %v909_v27 = vadd.f32 %v908_v26, %v741_v14 }
 0x2f3   : > { %v911_v28 = vsub.f32 0.0, %v907_v25 }
 0x2f4   : > { %v912_v29 = vsub.f32 0.0, %v909_v27 }
 0x2f5   : > { %v913_v30 = vmul.f32 1.442695, %v911_v28  ;;  %v1119_v26 = vpop.permute.xlu0 %1118 }
 0x2f6   : > { %v915_v32 = vmul.f32 1.442695, %v912_v29 }
 0x2f7   : > { %2073 = vpow2.f32 %v913_v30 }
 0x2f8   : > { %2075 = vpow2.f32 %v915_v32 }
 0x301   : > { %v2074_v35 = vpop.eup %2073 }
 0x302   : > { %v2076_v38 = vpop.eup %2075  ;;  %v917_v39 = vadd.f32 1.0, %v2074_v35 }
 0x303   : > { %v918_v40 = vadd.f32 1.0, %v2076_v38  ;;  %v943_v38 = vmul.f32 0.0, %v2442_v44 }
 0x304   : > { %2077 = vrcp.f32 %v917_v39 }
 0x305   : > { %2079 = vrcp.f32 %v918_v40 }
 0x30e   : > { %v2078_v45 = vpop.eup %2077 }
 0x30f   : > { %v2080_v47 = vpop.eup %2079  ;;  %v921_v48 = vmul.f32 %v2078_v45, %v907_v25  ;;  %v1141_v25 = vpop.permute.xlu1 %1140 }
 0x310   : > { %v922_v52 = vmul.f32 %v2080_v47, %v909_v27 }
 0x311   : > { %v965_v56 = vmul.f32 %v960_v46, %v921_v48  ;;  %v986_v57 = vmul.f32 %v981_v49, %v921_v48  ;;  %v1007_v58 = vmul.f32 %v1002_v50, %v921_v48  ;;  %v1027_v59 = vmul.f32 %v1020_v31, %v921_v48 }
 0x312   : > { %v966_v60 = vmul.f32 %v959_v15, %v922_v52  ;;  %v987_v63 = vmul.f32 %v980_v16, %v922_v52  ;;  %v1008_v1 = vmul.f32 %v1001_v19, %v922_v52  ;;  %v1028_v2 = vmul.f32 %v1023_v51, %v922_v52 }
 0x313   : > { %v1048_v3 = vmul.f32 %v1041_v34, %v921_v48  ;;  %v1049_v4 = vmul.f32 %v1044_v53, %v922_v52  ;;  %v1069_v5 = vmul.f32 %v1062_v37, %v921_v48  ;;  %v1070_v8 = vmul.f32 %v1065_v54, %v922_v52 }
 0x314   : > { %v1988_v9 = vpack.i.bf16 %v1028_v2, %v1027_v59  ;;  %v945_v10 = vmul.f32 %v938_v43, %v922_v52  ;;  %v944_v13 = vmul.f32 %v939_v55, %v921_v48  ;;  %v1840_v14 = vpack.c.bf16 %v922_v52, %v2285_v62 }
 0x315   : > { %v1993_v11 = vpack.i.bf16 %v1049_v4, %v1048_v3  ;;  %v1998_v12 = vpack.i.bf16 %v1070_v8, %v1069_v5  ;;  %v1968_v17 = vpack.i.bf16 %v922_v52, %v921_v48  ;;  %v1842_v18 = vpack.c.bf16 %v921_v48, %v2283_v61 }
 0x316   : > { %v1983_v7 = vpack.i.bf16 %v1008_v1, %v1007_v58  ;;  %v1973_v20 = vpack.i.bf16 %v966_v60, %v965_v56  ;;  %1841 = vmatprep.subr.bf16.mxu1 %v1840_v14  ;;  %v1978_v15 = vpack.i.bf16 %v987_v63, %v986_v57  ;;  %v2003_v16 = vpack.i.bf16 %v945_v10, %v944_v13 }
 0x317   : > { %1969 = vrot.lane.b32.xlu1 %v1968_v17, %s2130_s29  ;;  %1843 = vmatpush1.bf16.msra.mxu1 %v1842_v18  ;;  %v1050_v19 = vmul.f32 0.0, %v1043_v33  ;;  %v1071_v61 = vmul.f32 0.0, %v1064_v36  ;;  %v1086_v62 = vsel %vm639_vm8, %v1083_v42, %v1085_v41  ;;  %v1090_v21 = vmul.f32 %v1083_v42, %v921_v48 }
 0x318   : > { %1984 = vrot.lane.b32.xlu0 %v1983_v7, %s2123_s27  ;;  %s2570_s27 = smov 94   ;;  %v1091_v22 = vmul.f32 %v1086_v62, %v922_v52 }
 0x31b   : > { %1974 = vrot.lane.b32.xlu1 %v1973_v20, %s2125_s15  ;;  %s1789_s15 = sshll.u32 %s2572_s14, 5 }
 0x31c   : > { %1989 = vrot.lane.b32.xlu0 %v1988_v9, %s2132_s12  ;;  %s359_s12 = scalar_lea.vmem %s2564_s10, %s1789_s15 }
 0x31f   : > { %1979 = vrot.lane.b32.xlu1 %v1978_v15, %s2131_s11 }
 0x320   : > { %1994 = vrot.lane.b32.xlu0 %v1993_v11, %s2133_s16 }
 0x323   : > { %1151 = vrot.lane.b32.xlu1 %v1050_v19, %s2133_s16  ;;  %v1778_v19 = vld [vmem:[%s2559_s5 + $0x8] sm:$0xff] }
 0x324   : > { %1999 = vrot.lane.b32.xlu0 %v1998_v12, %s2569_s22 }
 0x327   : > { %1162 = vrot.lane.b32.xlu1 %v1071_v61, %s2569_s22  ;;  %v1376_v61 = vld [vmem:[%s2561_s7 + $0x8] sm:$0xff] }
 0x328   : > { %1169 = vrot.lane.b32.xlu0 %v1090_v21, %s2570_s27 }
 0x32b   : > { %1171 = vrot.lane.b32.xlu1 %v1091_v22, %s2570_s27 }
 0x32c   : > { %1173 = vrot.lane.b32.xlu0 %v1092_v6, %s2570_s27 }
 0x32f   : > { %2004 = vrot.lane.b32.xlu1 %v2003_v16, %s2129_s28 }
 0x389   : > { %v1970_v27 = vpop.permute.xlu1 %1969 }
 0x38a   : > { %v1972_v28 = vunpack.i.h.bf16 %v1970_v27  ;;  %v1971_v29 = vunpack.i.l.bf16 %v1970_v27  ;;  %v1985_v30 = vpop.permute.xlu0 %1984 }
 0x38b   : > { %v1987_v34 = vunpack.i.h.bf16 %v1985_v30  ;;  %v1986_v35 = vunpack.i.l.bf16 %v1985_v30 }
 0x38c   : > { %v1132_v31 = vsel %vm478_vm9, %v1971_v29, %v1972_v28 }
 0x38d   : > { %v2008_v32 = vpack.i.bf16 %v1972_v28, %v1132_v31  ;;  %v1975_v33 = vpop.permute.xlu1 %1974  ;;  %v1125_v42 = vsel %vm501_vm4, %v1986_v35, %v1987_v34  ;;  %v1124_v48 = vsel %vm501_vm4, %v1119_v26, %v1986_v35 }
 0x38e   : > { %v1976_v36 = vunpack.i.l.bf16 %v1975_v33  ;;  %v1990_v37 = vpop.permute.xlu0 %1989  ;;  %v1977_v43 = vunpack.i.h.bf16 %v1975_v33  ;;  %v2033_v49 = vpack.i.bf16 %v1987_v34, %v1125_v42 }
 0x38f   : > { %2009 = vrot.lane.b32.xlu1 %v2008_v32, %s2129_s28  ;;  %v1991_v50 = vunpack.i.l.bf16 %v1990_v37  ;;  %v1992_v60 = vunpack.i.h.bf16 %v1990_v37 }
 0x390   : > { %v1102_v39 = vsel %vm547_vm2, %v1097_v24, %v1976_v36  ;;  %v1103_v52 = vsel %vm547_vm2, %v1976_v36, %v1977_v43  ;;  %vm1581_vm2 = vcmask 15360  }
 0x391   : > { %v1980_v40 = vpop.permute.xlu1 %1979  ;;  %v2013_v41 = vpack.i.bf16 %v1102_v39, %v943_v38  ;;  %v2023_v57 = vpack.i.bf16 %v1977_v43, %v1103_v52  ;;  %v2038_v58 = vpack.i.bf16 %v1991_v50, %v1971_v29  ;;  %v1142_v9 = vsel %vm697_vm12, %v1991_v50, %v1992_v60 }
 0x392   : > { %v1981_v45 = vunpack.i.l.bf16 %v1980_v40  ;;  %v1995_v46 = vpop.permute.xlu0 %1994  ;;  %v1982_v53 = vunpack.i.h.bf16 %v1980_v40  ;;  %v1143_v10 = vsel %vm697_vm12, %v1992_v60, %v1141_v25 }
 0x393   : > { %2014 = vrot.lane.b32.xlu1 %v2013_v41, %s2129_s28  ;;  %v1997_v5 = vunpack.i.h.bf16 %v1995_v46  ;;  %v1996_v8 = vunpack.i.l.bf16 %v1995_v46  ;;  %v2043_v13 = vpack.i.bf16 %v1143_v10, %v1142_v9 }
 0x394   : > { %v1113_v47 = vsel %vm667_vm10, %v1108_v23, %v1981_v45  ;;  %v1114_v63 = vsel %vm667_vm10, %v1981_v45, %v1982_v53 }
 0x395   : > { %v1152_v44 = vpop.permute.xlu1 %1151  ;;  %v2018_v51 = vpack.i.bf16 %v1124_v48, %v1113_v47  ;;  %v2028_v3 = vpack.i.bf16 %v1982_v53, %v1114_v63  ;;  %v1153_v14 = vsel %vm709_vm13, %v1996_v8, %v1997_v5 }
 0x396   : > { %v2000_v54 = vpop.permute.xlu0 %1999  ;;  %v1154_v17 = vsel %vm709_vm13, %v1997_v5, %v1152_v44 }
 0x397   : > { %v2002_v55 = vunpack.i.h.bf16 %v2000_v54  ;;  %v2001_v56 = vunpack.i.l.bf16 %v2000_v54  ;;  %2019 = vrot.lane.b32.xlu0 %v2018_v51, %s2129_s28  ;;  %2034 = vrot.lane.b32.xlu1 %v2033_v49, %s2129_s28  ;;  %v2048_v7 = vpack.i.bf16 %v1154_v17, %v1153_v14 }
 0x399   : > { %v1163_v59 = vpop.permute.xlu1 %1162  ;;  %v1164_v1 = vsel %vm721_vm11, %v2001_v56, %v2002_v55  ;;  %v2053_v20 = vpack.i.bf16 %v2001_v56, %v1996_v8 }
 0x39a   : > { %v1165_v2 = vsel %vm721_vm11, %v2002_v55, %v1163_v59  ;;  %v1170_v12 = vpop.permute.xlu0 %1169 }
 0x39b   : > { %2024 = vrot.lane.b32.xlu0 %v2023_v57, %s2129_s28  ;;  %2039 = vrot.lane.b32.xlu1 %v2038_v58, %s2129_s28  ;;  %v2058_v4 = vpack.i.bf16 %v1165_v2, %v1164_v1 }
 0x39d   : > { %v1172_v11 = vpop.permute.xlu1 %1171 }
 0x39e   : > { %v1175_v18 = vsel %vm733_vm14, %v1170_v12, %v1172_v11  ;;  %v1174_v15 = vpop.permute.xlu0 %1173 }
 0x39f   : > { %2029 = vrot.lane.b32.xlu0 %v2028_v3, %s2129_s28  ;;  %2059 = vrot.lane.b32.xlu1 %v2058_v4, %s2129_s28  ;;  %v1176_v16 = vsel %vm733_vm14, %v1172_v11, %v1174_v15 }
 0x3a1   : > { %v2005_v62 = vpop.permute.xlu1 %2004 }
 0x3a2   : > { %v2007_v24 = vunpack.i.h.bf16 %v2005_v62  ;;  %v2006_v25 = vunpack.i.l.bf16 %v2005_v62 }
 0x3a3   : > { %2044 = vrot.lane.b32.xlu0 %v2043_v13, %s2129_s28  ;;  %1239 = vrot.lane.b32.xlu1 %v1175_v18, %s2129_s28 }
 0x3a4   : > { %v1244_v34 = vsel %vm639_vm8, %v2006_v25, %v2007_v24 }
 0x3a7   : > { %2049 = vrot.lane.b32.xlu0 %v2048_v7, %s2129_s28  ;;  %1237 = vrot.lane.b32.xlu1 %v1170_v12, %s2129_s28 }
 0x3ab   : > { %2054 = vrot.lane.b32.xlu0 %v2053_v20, %s2129_s28 }
 0x3af   : > { %1241 = vrot.lane.b32.xlu0 %v1176_v16, %s2129_s28 }
 0x3b3   : > { %1183 = vperm.xlu0 %1872, %v1778_v19  }
 0x3b7   : > { %1384 = vperm.xlu0 %1872, %v1376_v61  }
 0x401   : > { %v2010_v21 = vpop.permute.xlu1 %2009 }
 0x402   : > { %v2012_v46 = vunpack.i.h.bf16 %v2010_v21  ;;  %v2011_v47 = vunpack.i.l.bf16 %v2010_v21  ;;  %v1777_v21 = vld [vmem:[%s2558_s4 + $0x8] sm:$0xff] }
 0x404   : > { %v1252_v60 = vsel %vm639_vm8, %v2011_v47, %v2012_v46 }
 0x405   : > { %v2015_v6 = vpop.permute.xlu1 %2014 }
 0x406   : > { %v2016_v26 = vunpack.i.l.bf16 %v2015_v6  ;;  %v2017_v28 = vunpack.i.h.bf16 %v2015_v6 }
 0x408   : > { %v1243_v31 = vsel %vm639_vm8, %v2016_v26, %v2006_v25 }
 0x409   : > { %v2020_v22 = vpop.permute.xlu0 %2019  ;;  %v2035_v23 = vpop.permute.xlu1 %2034 }
 0x40a   : > { %v2022_v32 = vunpack.i.h.bf16 %v2020_v22  ;;  %v2037_v35 = vunpack.i.h.bf16 %v2035_v23  ;;  %v2036_v36 = vunpack.i.l.bf16 %v2035_v23  ;;  %v2021_v42 = vunpack.i.l.bf16 %v2020_v22  ;;  %v1375_v22 = vld [vmem:[%s2561_s7] sm:$0xff] }
 0x40b   : > { %1379 = vperm.xlu1 %2063, %v1375_v22   ;;  %v1579_v22 = vld [vmem:[%s2563_s9] sm:$0xff] }
 0x40c   : > { %v1249_v49 = vsel %vm639_vm8, %v2022_v32, %v2036_v36  ;;  %v1250_v51 = vsel %vm639_vm8, %v2036_v36, %v2037_v35 }
 0x40d   : > { %v2025_v27 = vpop.permute.xlu0 %2024  ;;  %v2040_v33 = vpop.permute.xlu1 %2039 }
 0x40e   : > { %v2027_v29 = vunpack.i.h.bf16 %v2025_v27  ;;  %v2026_v30 = vunpack.i.l.bf16 %v2025_v27  ;;  %v2041_v48 = vunpack.i.l.bf16 %v2040_v33  ;;  %v2042_v56 = vunpack.i.h.bf16 %v2040_v33 }
 0x410   : > { %v1245_v37 = vsel %vm639_vm8, %v2017_v28, %v2026_v30  ;;  %v1246_v38 = vsel %vm639_vm8, %v2026_v30, %v2027_v29  ;;  %v1251_v59 = vsel %vm639_vm8, %v2041_v48, %v2011_v47 }
 0x411   : > { %v1826_v39 = vpack.c.bf16 %v1245_v37, %v1243_v31  ;;  %v2030_v40 = vpop.permute.xlu0 %2029  ;;  %v1824_v41 = vpack.c.bf16 %v1246_v38, %v1244_v34  ;;  %v2060_v53 = vpop.permute.xlu1 %2059 }
 0x412   : > { %v2032_v43 = vunpack.i.h.bf16 %v2030_v40  ;;  %v2031_v45 = vunpack.i.l.bf16 %v2030_v40  ;;  %v2062_v63 = vunpack.i.h.bf16 %v2060_v53  ;;  %v2061_v1 = vunpack.i.l.bf16 %v2060_v53  ;;  %v1367_v40 = vld [vmem:[%s2560_s6] sm:$0xff] }
 0x413   : > { %1825 = vmatprep.subr.bf16.mxu0 %v1824_v41  ;;  %v1368_v41 = vld [vmem:[%s2560_s6 + $0x8] sm:$0xff] }
 0x414   : > { %v1247_v50 = vsel %vm639_vm8, %v2021_v42, %v2031_v45  ;;  %1827 = vmatpush1.bf16.msra.mxu0 %v1826_v39  ;;  %v1248_v44 = vsel %vm639_vm8, %v2031_v45, %v2032_v43  ;;  %v1258_v12 = vsel %vm639_vm8, %v2061_v1, %v2062_v63 }
 0x415   : > { %v1830_v52 = vpack.c.bf16 %v1249_v49, %v1247_v50  ;;  %v2045_v54 = vpop.permute.xlu0 %2044  ;;  %v1828_v55 = vpack.c.bf16 %v1250_v51, %v1248_v44  ;;  %v1240_v13 = vpop.permute.xlu1 %1239 }
 0x416   : > { %v2047_v57 = vunpack.i.h.bf16 %v2045_v54  ;;  %v2046_v58 = vunpack.i.l.bf16 %v2045_v54 }
 0x417   : > { %1829 = vmatprep.subr.bf16.mxu0 %v1828_v55 }
 0x418   : > { %v1253_v2 = vsel %vm639_vm8, %v2042_v56, %v2046_v58  ;;  %1831 = vmatpush1.bf16.msra.mxu0 %v1830_v52  ;;  %v1254_v3 = vsel %vm639_vm8, %v2046_v58, %v2047_v57 }
 0x419   : > { %v1834_v4 = vpack.c.bf16 %v1253_v2, %v1251_v59  ;;  %v2050_v5 = vpop.permute.xlu0 %2049  ;;  %v1832_v8 = vpack.c.bf16 %v1254_v3, %v1252_v60  ;;  %v1238_v62 = vpop.permute.xlu1 %1237 }
 0x41a   : > { %v2052_v9 = vunpack.i.h.bf16 %v2050_v5  ;;  %v2051_v10 = vunpack.i.l.bf16 %v2050_v5  ;;  %v1259_v6 = vsel %vm639_vm8, %v1238_v62, %v1240_v13 }
 0x41b   : > { %1833 = vmatprep.subr.bf16.mxu0 %v1832_v8 }
 0x41c   : > { %1835 = vmatpush1.bf16.msra.mxu0 %v1834_v4  ;;  %v1256_v11 = vsel %vm639_vm8, %v2051_v10, %v2052_v9 }
 0x41d   : > { %v2055_v14 = vpop.permute.xlu0 %2054  ;;  %v1836_v17 = vpack.c.bf16 %v1258_v12, %v1256_v11 }
 0x41e   : > { %v2057_v18 = vunpack.i.h.bf16 %v2055_v14  ;;  %v2056_v7 = vunpack.i.l.bf16 %v2055_v14 }
 0x41f   : > { %1837 = vmatprep.subr.bf16.mxu0 %v1836_v17 }
 0x420   : > { %v1255_v20 = vsel %vm639_vm8, %v2056_v7, %v2051_v10  ;;  %v1257_v15 = vsel %vm639_vm8, %v2057_v18, %v2061_v1 }
 0x421   : > { %v1838_v16 = vpack.c.bf16 %v1257_v15, %v1255_v20  ;;  %v1242_v19 = vpop.permute.xlu0 %1241  ;;  %v2136_v15 = vmov 0.0|0.0  }
 0x422   : > { %v1260_v61 = vsel %vm639_vm8, %v1240_v13, %v1242_v19 }
 0x423   : > { %1839 = vmatpush1.bf16.msra.mxu0 %v1838_v16 }
 0x424   : > { %1298 = vmatprep.subr.mxu0 %v1260_v61 }
 0x427   : > { %1299 = vmatpush1.msra.mxu0 %v1259_v6  ;;  %v1504_v6 = vld [vmem:[%s2562_s8] sm:$0x3] }
 0x428   : > { %1779 = vmatmul.mubr.msk.f32.vlgmr.msra.gmra.mrb[2].mxu0 %vm836_vm15, %v1777_v21  ;;  %1844 = vmatprep.subr.bf16.mxu0 %v2136_v15 }
 0x429   : > { %1800 = vmatprep.mubr.msk.f32.mxu0 %vm2137_vm1, %v2121_v0 }
 0x432   : > { %v1184_v23 = vpop.permute.xlu0 %1183 }
 0x436   : > { %v1385_v49 = vpop.permute.xlu0 %1384 }
 0x48a   : > { %v1380_v42 = vpop.permute.xlu1 %1379 }
 0x4fb   : > { %v1348_v24 = vpop.f32.mrb[2].mxu0 }
 0x4fc   : > { %v1349_v25 = vadd.f32 %v1348_v24, %v1184_v23  ;;  %v1350_v26 = vpop.f32.mrb[3].mxu0 }
 0x4fd   : > { %v1351_v27 = vadd.f32 %v1350_v26, %v1184_v23 }
 0x4fe   : > { %v1353_v28 = vsub.f32 0.0, %v1349_v25 }
 0x4ff   : > { %v1354_v29 = vsub.f32 0.0, %v1351_v27 }
 0x500   : > { %v1355_v30 = vmul.f32 1.442695, %v1353_v28 }
 0x501   : > { %v1357_v31 = vmul.f32 1.442695, %v1354_v29 }
 0x502   : > { %2081 = vpow2.f32 %v1355_v30 }
 0x503   : > { %2083 = vpow2.f32 %v1357_v31 }
 0x50c   : > { %v2082_v32 = vpop.eup %2081 }
 0x50d   : > { %v2084_v33 = vpop.eup %2083  ;;  %v1359_v34 = vadd.f32 1.0, %v2082_v32 }
 0x50e   : > { %v1360_v35 = vadd.f32 1.0, %v2084_v33 }
 0x50f   : > { %2085 = vrcp.f32 %v1359_v34 }
 0x510   : > { %2087 = vrcp.f32 %v1360_v35 }
 0x519   : > { %v2086_v36 = vpop.eup %2085 }
 0x51a   : > { %v2088_v37 = vpop.eup %2087  ;;  %v1363_v39 = vmul.f32 %v2086_v36, %v1349_v25  ;;  %v1580_v25 = vld [vmem:[%s2563_s9 + $0x8] sm:$0xff] }
 0x51b   : > { %v1364_v38 = vmul.f32 %v2088_v37, %v1351_v27 }
 0x51d   : > { %1398 = vmatprep.subr.mxu1 %v1364_v38 }
 0x51e   : > { %1399 = vmatpush1.msra.mxu1 %v1363_v39 }
 0x51f   : > { %1780 = vmatmul.mubr.msk.f32.vlgmr.msra.gmra.mrb[2].mxu1 %vm1387_vm0, %v1367_v40 }
 0x520   : > { %1464 = vmatprep.mubr.f32.mxu1 %v2121_v0 }
 0x523   : > { %1781 = vmatmul.mubr.msk.f32.gmra.mrb[4].mxu1 %vm1387_vm0, %v1368_v41 }
 0x5f2   : > { %v1460_v43 = vpop.f32.mrb[2].mxu1 }
 0x5f3   : > { %v1461_v45 = vadd.f32 %v1460_v43, %v1380_v42  ;;  %v1462_v46 = vpop.f32.mrb[3].mxu1 }
 0x5f4   : > { %v1463_v47 = vadd.f32 %v1462_v46, %v1380_v42 }
 0x5f5   : > { %v1471_v48 = vsub.f32 0.0, %v1461_v45 }
 0x5f6   : > { %v1472_v50 = vsub.f32 0.0, %v1463_v47  ;;  %v1466_v44 = vpop.f32.mrb[4].mxu1 }
 0x5f7   : > { %v1475_v51 = vmul.f32 1.442695, %v1471_v48  ;;  %v1467_v52 = vadd.f32 %v1466_v44, %v1385_v49  ;;  %v1468_v53 = vpop.f32.mrb[5].mxu1 }
 0x5f8   : > { %v1477_v54 = vmul.f32 1.442695, %v1472_v50  ;;  %v1469_v55 = vadd.f32 %v1468_v53, %v1385_v49 }
 0x5f9   : > { %2089 = vpow2.f32 %v1475_v51  ;;  %v1473_v56 = vsub.f32 0.0, %v1467_v52 }
 0x5fa   : > { %2091 = vpow2.f32 %v1477_v54  ;;  %v1474_v57 = vsub.f32 0.0, %v1469_v55 }
 0x5fb   : > { %v1479_v58 = vmul.f32 1.442695, %v1473_v56 }
 0x5fc   : > { %v1481_v59 = vmul.f32 1.442695, %v1474_v57 }
 0x5fd   : > { %2093 = vpow2.f32 %v1479_v58 }
 0x5fe   : > { %2095 = vpow2.f32 %v1481_v59 }
 0x603   : > { %v2090_v60 = vpop.eup %2089 }
 0x604   : > { %v2092_v63 = vpop.eup %2091  ;;  %v1483_v1 = vadd.f32 1.0, %v2090_v60 }
 0x605   : > { %v1484_v2 = vadd.f32 1.0, %v2092_v63 }
 0x606   : > { %2097 = vrcp.f32 %v1483_v1 }
 0x607   : > { %v2094_v3 = vpop.eup %2093  ;;  %2099 = vrcp.f32 %v1484_v2 }
 0x608   : > { %v2096_v4 = vpop.eup %2095  ;;  %v1485_v5 = vadd.f32 1.0, %v2094_v3 }
 0x609   : > { %v1486_v8 = vadd.f32 1.0, %v2096_v4 }
 0x60a   : > { %2101 = vrcp.f32 %v1485_v5 }
 0x60b   : > { %2103 = vrcp.f32 %v1486_v8 }
 0x610   : > { %v2098_v9 = vpop.eup %2097 }
 0x611   : > { %v2100_v10 = vpop.eup %2099  ;;  %v1491_v11 = vmul.f32 %v2098_v9, %v1461_v45 }
 0x612   : > { %v1492_v12 = vmul.f32 %v2100_v10, %v1463_v47 }
 0x614   : > { %v2102_v13 = vpop.eup %2101  ;;  %v1495_v14 = vadd.f32 %v1492_v12, %v1491_v11 }
 0x615   : > { %v2104_v17 = vpop.eup %2103  ;;  %v1493_v18 = vmul.f32 %v2102_v13, %v1467_v52 }
 0x616   : > { %v1494_v7 = vmul.f32 %v2104_v17, %v1469_v55  ;;  %1496 = vadd.xlane.f32.xlu1 %v1495_v14 }
 0x618   : > { %v1498_v20 = vadd.f32 %v1494_v7, %v1493_v18 }
 0x61a   : > { %1499 = vadd.xlane.f32.xlu0 %v1498_v20 }
 0x6a3   : > { %v1497_v16 = vpop.xlane.xlu1 %1496 }
 0x6a4   : > { %v1502_v61 = vmul.f32 0.00390625, %v1497_v16 }
 0x6a7   : > { %v1500_v19 = vpop.xlane.xlu0 %1499 }
 0x6a8   : > { %v1503_v62 = vmul.f32 0.00390625, %v1500_v19 }
 0x6aa   : > { %v1845_v21 = vpack.c.bf16 %v1503_v62, %v1502_v61 }
 0x6ac   : > { %1846 = vmatpush3.bf16.msra.mxu0 %v1845_v21 }
 0x6af   : > { %1801 = vmatmul.mubr.msk.f32.vlgmr.msra.gmra.mrb[4].mxu0 %vm616_vm7, %v1504_v6 }
 0x6b0   : > { %1805 = vmatprep.mubr.msk.f32.mxu0 %vm1581_vm2, %v1579_v22 }
 0x782   : > { %v1574_v23 = vpop.f32.mrb[4].mxu0 }
 0x783   : > { %v1578_v0 = vmax.f32 %v1574_v23, 0.0  ;;  %v1802_v24 = vpop.f32.mrb[5].mxu0 }
 0x785   : > { %1803 = vmatprep.subr.msk.mxu0 %vm1588_vm3, %v1578_v0 }
 0x786   : > { %1804 = vmatpush3.msk.msra.mxu0 %vm1588_vm3, %v1578_v0 }
 0x787   : > { %1806 = vmatmul.mubr.msk.f32.vlgmr.msra.gmra.mrb[6].mxu0 %vm1581_vm2, %v1580_v25 }
 0x85a   : > { %v1807_v26 = vpop.f32.mrb[6].mxu0 }
 0x85b   : > { %v1668_v27 = vsub.f32 0.0, %v1807_v26  ;;  %v1658_v28 = vpop.f32.mrb[7].mxu0 }
 0x85c   : > { %v1667_v29 = vsub.f32 0.0, %v1658_v28 }
 0x85d   : > { %v1671_v30 = vmul.f32 1.442695, %v1668_v27 }
 0x85e   : > { %v1669_v31 = vmul.f32 1.442695, %v1667_v29 }
 0x85f   : > { %2105 = vpow2.f32 %v1671_v30 }
 0x860   : > { %2107 = vpow2.f32 %v1669_v31 }
 0x869   : > { %v2106_v32 = vpop.eup %2105 }
 0x86a   : > { %v2108_v33 = vpop.eup %2107  ;;  %v1674_v34 = vadd.f32 1.0, %v2106_v32 }
 0x86b   : > { %v1673_v35 = vadd.f32 1.0, %v2108_v33 }
 0x86c   : > { %2109 = vrcp.f32 %v1674_v34 }
 0x86d   : > { %2111 = vrcp.f32 %v1673_v35 }
 0x876   : > { %v2110_v36 = vpop.eup %2109 }
 0x877   : > { %v2112_v37 = vpop.eup %2111  ;;  %1684 = vperm.xlu1 %2063, %v2110_v36  }
 0x878   : > { %1679 = vperm.xlu0 %1872, %v2112_v37  }
 0x8f6   : > { %v1685_v38 = vpop.permute.xlu1 %1684 }
 0x8f7   : > { %v1689_v39 = vmul.f32 %v1685_v38, %v1493_v18  ;;  %v1690_v40 = vmul.f32 %v1685_v38, %v1494_v7  ;;  %v1680_v41 = vpop.permute.xlu0 %1679 }
 0x8f8   : > { %v1687_v42 = vmul.f32 %v1680_v41, %v1491_v11  ;;  %v1688_v43 = vmul.f32 %v1680_v41, %v1492_v12 }
 0x8f9   : > { %1693 = vst [vmem:[%s359_s12 + $0x10] sm:$0xff] %v1689_v39  ;;  %1694 = vst [vmem:[%s359_s12 + $0x18] sm:$0xff] %v1690_v40 }
 0x8fa   : > { %1691 = vst [vmem:[%s359_s12] sm:$0xff] %v1687_v42  ;;  %1692 = vst [vmem:[%s359_s12 + $0x8] sm:$0xff] %v1688_v43 }
 0x8fb PF: > { %s20_s13 = sadd.s32 1, %s2119_s13  }
 0x8fc   : > { %p17_p4 = scmp.ge.s32.totalorder %s20_s13, 4  }
 0x8fe   :  { %19 = sbr.rel (!%p17_p4) target bundleno = 1 (0x1), region = 99 }

</bundles_post_ra>
